<compile_context>
chip_gen: v7x
topology: tpu7x:2x2x1
jax: 0.10.0
libtpu: 0.0.40
codegen_flags: <defaults>
</compile_context>

<pallas_src>
import functools

import numpy as np
import jax
import jax.numpy as jnp
from jax import lax
from jax.experimental import pallas as pl
from jax.experimental.pallas import tpu as pltpu


def _round_up(x, m):
    return (x + m - 1) // m * m


# ----------------------------------------------------------------------------
# elementwise bin function (entmoid15) -- used both in-kernel and in reference
# ----------------------------------------------------------------------------
def _entmoid15(x):
    ax = jnp.abs(x)
    is_pos = x >= 0
    tau = (ax + jnp.sqrt(jnp.maximum(8.0 - ax * ax, 0.0))) * 0.5
    tau = jnp.where(tau <= ax, 2.0, tau)
    y_neg = 0.25 * jnp.maximum(tau - ax, 0.0) ** 2
    return jnp.where(is_pos, 1.0 - y_neg, y_neg)


# ----------------------------------------------------------------------------
# choice function (entmax15) over the feature axis -- parameter-only, plain JAX
# ----------------------------------------------------------------------------
def _entmax15(x, axis):
    x = x - jnp.max(x, axis=axis, keepdims=True)
    x = x / 2.0
    n = x.shape[axis]
    xs = jnp.flip(jnp.sort(x, axis=axis), axis=axis)  # descending
    shape = [1] * x.ndim
    shape[axis] = n
    rho = jnp.arange(1, n + 1, dtype=x.dtype).reshape(shape)
    mean = jnp.cumsum(xs, axis=axis) / rho
    mean_sq = jnp.cumsum(xs * xs, axis=axis) / rho
    ss = rho * (mean_sq - mean * mean)
    delta = (1.0 - ss) / rho
    tau = mean - jnp.sqrt(jnp.maximum(delta, 0.0))
    support = jnp.sum((tau <= xs).astype(jnp.int32), axis=axis, keepdims=True)
    tau_star = jnp.take_along_axis(tau, support - 1, axis=axis)
    return jnp.maximum(x - tau_star, 0.0) ** 2


def _bin_codes(depth):
    C = 2 ** depth
    d = jnp.arange(depth)[:, None]
    c = jnp.arange(C)[None, :]
    return ((c // (2 ** d)) % 2).astype(jnp.float32)                 # (D, C)


# ----------------------------------------------------------------------------
# expansion matrix: compact (d,t) lanes -> lane-flat (d, t*C+c) terms in one
# matmul, with the 0/1 bin-code blend folded in.  Entries are {0, +1, -1} plus
# a code-offset row at the "ones lane" (exact in bf16).
#   term[b, d*TC + t*C + c] = code[d,c] + bp[b, d*T+t] * (1 - 2*code[d,c])
# ----------------------------------------------------------------------------
def build_expansion(depth, num_trees, dt_pad):
    D, T = depth, num_trees
    C = 2 ** D
    TC = T * C
    ones_lane = D * T
    ex = np.zeros((dt_pad, D * TC), np.float32)
    c = np.arange(C)
    for d in range(D):
        code = ((c >> d) & 1).astype(np.float32)                      # (C,)
        for t in range(T):
            cols = d * TC + t * C + c
            ex[d * T + t, cols] = 1.0 - 2.0 * code
            ex[ones_lane, cols] = code
    return jnp.asarray(ex, dtype=jnp.bfloat16)


# ----------------------------------------------------------------------------
# Pallas kernel: full DenseODSTBlock (all layers) on one batch tile
# ----------------------------------------------------------------------------
def _node_dense_kernel(x_ref, ex_ref, *refs,
                       num_layers, num_trees, depth, tree_dim,
                       f0, f_row0, h_rows):
    L, T, D, td = num_layers, num_trees, depth, tree_dim
    C = 2 ** D
    TC = T * C
    Ttd = T * td
    out_ref = refs[3 * L]
    feat_ref = refs[3 * L + 1]                     # persistent bf16 concat scratch

    bb = x_ref.shape[0]
    out_w = out_ref.shape[1]

    # stage the dense concat [x | h_0 | ... | h_{L-2}] (review item 6);
    # zero first so padded lanes never feed NaN garbage into the matmul.
    feat_ref[...] = jnp.zeros_like(feat_ref)
    feat_ref[:, 0:f0] = x_ref[...].astype(jnp.bfloat16)

    # zero only the padded tail of the packed output slab (never read upstream)
    pad_w = out_w - L * Ttd
    if pad_w > 0:
        out_ref[:, L * Ttd:out_w] = jnp.zeros((bb, pad_w), jnp.float32)

    ex = ex_ref[...]                               # (dt_pad, D*TC) bf16, {0, +/-1, codes}

    for l in range(L):
        fsel_ref = refs[3 * l + 0]                 # (f_row0 + l*h_rows, dt_pad) bf16
        thr_ref = refs[3 * l + 1]                  # (1, dt_pad) f32 (temp folded)
        resp_ref = refs[3 * l + 2]                 # (TC, T*td) bf16 block-diagonal

        k_l = f_row0 + l * h_rows
        # ONE feature matmul per layer over the staged concat (bf16 ops, f32 acc)
        fv = jnp.dot(feat_ref[:, 0:k_l], fsel_ref[...],
                     preferred_element_type=jnp.float32)               # (bb, dt_pad)

        # threshold subtraction in f32 (review correctness note), then the bin
        # function at COMPACT width D*T (+1 ones lane), not D*T*C.
        tl = fv - thr_ref[...]
        bp = _entmoid15(tl)                        # bp[:, D*T] == 1.0 exactly (thr = -100)

        # expand (d,t)->(d,t*C+c) + fold the 0/1 code blend in one MXU matmul.
        # hi/lo bf16 split keeps bp at ~f32 precision through the MXU.
        bp_hi = bp.astype(jnp.bfloat16)
        bp_lo = (bp - bp_hi.astype(jnp.float32)).astype(jnp.bfloat16)
        terms = (jnp.dot(bp_hi, ex, preferred_element_type=jnp.float32)
                 + jnp.dot(bp_lo, ex, preferred_element_type=jnp.float32))  # (bb, D*TC)

        # response_weights: product over depth of aligned 128-lane slices
        rw = terms[:, 0:TC]
        for d in range(1, D):
            rw = rw * terms[:, d * TC:(d + 1) * TC]

        # fused per-tree response contraction; output kept compact at T*td cols
        h = jnp.dot(rw.astype(jnp.bfloat16), resp_ref[...],
                    preferred_element_type=jnp.float32)                # (bb, T*td)

        # pack all layers into one compact batch-major output slab (review item 5)
        out_ref[:, l * Ttd:(l + 1) * Ttd] = h

        if l + 1 < L:
            a = f_row0 + l * h_rows
            feat_ref[:, a:a + Ttd] = h.astype(jnp.bfloat16)            # bf16 h feed


# ----------------------------------------------------------------------------
# parameter init (deterministic, mirrors ODST.__init__ shapes)
# ----------------------------------------------------------------------------
def init_odst_params(key, in_features, num_trees, depth, tree_dim):
    C = 2 ** depth
    k1, k2, k3 = jax.random.split(key, 3)
    response = jax.random.normal(k1, (num_trees, tree_dim, C), jnp.float32)            # normal_
    sel_logits = jax.random.uniform(k2, (in_features, num_trees, depth), jnp.float32)  # uniform_
    # TODO(synk): original ODST data-aware-initializes feature_thresholds /
    # log_temperatures from the first batch (quantile init); we initialize them
    # deterministically here instead.
    thresholds = 0.1 * jax.random.normal(k3, (num_trees, depth), jnp.float32)
    log_temps = jnp.zeros((num_trees, depth), jnp.float32)
    return response, sel_logits, thresholds, log_temps


# ----------------------------------------------------------------------------
# parameter prep: compact lane layout (col = d*T + t), bf16 storage
# ----------------------------------------------------------------------------
def prep_layer(raw, layer_idx, *, num_trees, depth, tree_dim,
               f0, f_row0, h_rows, dt_pad):
    response, sel_logits, thresholds, log_temps = raw
    T, D, td = num_trees, depth, tree_dim
    C = 2 ** D
    TC = T * C
    Ttd = T * td
    F_l = sel_logits.shape[0]                      # = f0 + layer_idx*T*td (dense concat)

    fsel = _entmax15(sel_logits, axis=0)           # choice over features: (F_l, T, D)
    invt = jnp.exp(-log_temps)                     # (T, D); temperature folded into params

    # compact column layout col = d*T + t (NO replication over the 2**depth bins)
    fsel_dt = jnp.transpose(fsel * invt[None, :, :], (0, 2, 1)).reshape(F_l, D * T)
    fsel_c = jnp.zeros((F_l, dt_pad), jnp.float32).at[:, :D * T].set(fsel_dt)

    thr_dt = jnp.transpose(thresholds * invt, (1, 0)).reshape(D * T)
    thr_c = jnp.zeros((dt_pad,), jnp.float32).at[:D * T].set(thr_dt)
    # ones-lane trick: the selector column D*T is all-zero so fv==0 there; a -100
    # threshold makes entmoid15 return exactly 1.0, carrying the 0/1 bin-code
    # offsets through the expansion matmul (replaces the code_mask input).
    thr_c = thr_c.at[D * T].set(-100.0).reshape(1, dt_pad)

    # scatter selector rows into the staged-concat row layout [x | h_0 | ...]
    rows = [np.arange(f0, dtype=np.int32)]
    for m in range(layer_idx):
        rows.append(f_row0 + m * h_rows + np.arange(Ttd, dtype=np.int32))
    rows = np.concatenate(rows)
    n_rows = f_row0 + layer_idx * h_rows
    fsel_pad = jnp.zeros((n_rows, dt_pad), jnp.float32).at[rows].set(fsel_c)

    # per-tree block-diagonal response, kept compact at T*td output columns
    resp_tcj = jnp.transpose(response, (0, 2, 1))                       # (T, C, td)
    eye_t = jnp.eye(T, dtype=jnp.float32)
    resp_bd = jnp.einsum('tcj,ts->tcsj', resp_tcj, eye_t).reshape(TC, Ttd)

    return (fsel_pad.astype(jnp.bfloat16), thr_c, resp_bd.astype(jnp.bfloat16))


# ----------------------------------------------------------------------------
# DenseODSTBlock forward (max_features=None, eval mode => no input_dropout)
# ----------------------------------------------------------------------------
def node_backbone_forward(x, layer_params, expansion, *, num_layers, num_trees,
                          depth, tree_dim, f0, f_row0, h_rows, dt_pad,
                          block_b=512, single_buffer_params=True):
    B = x.shape[0]
    L, T, D, td = num_layers, num_trees, depth, tree_dim
    C = 2 ** D
    TC = T * C
    Ttd = T * td
    out_w = _round_up(L * Ttd, 128)                # packed, lane-dense output slab

    # large batch tile (sweep per generation); keep >=2 grid steps for v7x megacore
    bb = min(block_b, _round_up(B, 8))
    if B > 8 and pl.cdiv(B, bb) < 2:
        bb = _round_up(pl.cdiv(B, 2), 8)
    n_tiles = pl.cdiv(B, bb)
    b_pad = n_tiles * bb
    if b_pad != B:
        x = jnp.pad(x, ((0, b_pad - B), (0, 0)))

    def _pspec(shape):
        # grid-invariant parameter block: single-buffered when supported
        if single_buffer_params:
            return pl.BlockSpec(shape, lambda i: (0,) * len(shape),
                                pipeline_mode=pl.Buffered(1))
        return pl.BlockSpec(shape, lambda i: (0,) * len(shape))

    in_specs = [pl.BlockSpec((bb, f0), lambda i: (i, 0)),
                _pspec(expansion.shape)]
    inputs = [x, expansion]
    for (fsel_pad, thr_c, resp_bd) in layer_params:
        in_specs += [_pspec(fsel_pad.shape), _pspec(thr_c.shape), _pspec(resp_bd.shape)]
        inputs += [fsel_pad, thr_c, resp_bd]

    kernel = functools.partial(
        _node_dense_kernel, num_layers=L, num_trees=T, depth=D, tree_dim=td,
        f0=f0, f_row0=f_row0, h_rows=h_rows)

    out = pl.pallas_call(
        kernel,
        out_shape=jax.ShapeDtypeStruct((b_pad, out_w), jnp.float32),
        grid_spec=pltpu.PrefetchScalarGridSpec(
            num_scalar_prefetch=0,
            grid=(n_tiles,),
            in_specs=in_specs,
            out_specs=pl.BlockSpec((bb, out_w), lambda i: (i, 0)),
            scratch_shapes=[pltpu.VMEM((bb, f_row0 + (L - 1) * h_rows), jnp.bfloat16)],
        ),
        compiler_params=pltpu.CompilerParams(
            dimension_semantics=("parallel",)),
    )(*inputs)

    # strip batch tail + lane padding; output is already batch-major (no transpose)
    return out[:B, :L * Ttd].reshape(B, L * T, td)


# ----------------------------------------------------------------------------
# pure-JAX reference (literal translation of the torch ODST / DenseODSTBlock)
# ----------------------------------------------------------------------------
def _odst_ref(x, response, sel_logits, thresholds, log_temps, depth):
    fsel = _entmax15(sel_logits, axis=0)
    fv = jnp.einsum('bi,ind->bnd', x, fsel, precision=lax.Precision.HIGHEST)
    tl = (fv - thresholds[None]) * jnp.exp(-log_temps)[None]
    bins = _entmoid15(jnp.stack([-tl, tl], axis=-1))                 # (B,T,D,2)
    codes = _bin_codes(depth)
    codes_1hot = jnp.stack([codes, 1.0 - codes], axis=-1)            # (D,C,2)
    bm = jnp.einsum('btds,dcs->btdc', bins, codes_1hot, precision=lax.Precision.HIGHEST)
    rw = jnp.prod(bm, axis=-2)                                       # (B,T,C)
    resp = jnp.einsum('bnd,ncd->bnc', rw, response, precision=lax.Precision.HIGHEST)
    return resp.reshape(x.shape[0], -1)


def backbone_ref(x, raw_params, num_trees, depth, tree_dim, num_layers):
    feats = x
    outs = []
    for p in raw_params:
        h = _odst_ref(feats, *p, depth=depth)
        outs.append(h)
        feats = jnp.concatenate([feats, h], axis=-1)
    out = jnp.concatenate(outs, axis=-1)
    return out.reshape(x.shape[0], num_layers * num_trees, tree_dim)


# ----------------------------------------------------------------------------
if __name__ == "__main__":
    # small config consistent with NODEBackbone hparams
    B = 32
    continuous_dim, embedded_cat_dim = 12, 4
    num_trees, num_layers, depth = 8, 2, 4
    output_dim, additional_tree_output_dim = 1, 2
    tree_dim = output_dim + additional_tree_output_dim               # tree_output_dim
    input_dim = continuous_dim + embedded_cat_dim                    # node_input_dim

    key = jax.random.PRNGKey(0)
    kx, kp = jax.random.split(key)
    x = jax.random.normal(kx, (B, input_dim), jnp.float32)

    raw_params = []
    feats = input_dim
    layer_keys = jax.random.split(kp, num_layers)
    for l in range(num_layers):
        raw_params.append(init_odst_params(layer_keys[l], feats, num_trees, depth, tree_dim))
        feats += num_trees * tree_dim                                # dense (max_features=None)

    f0 = input_dim
    f_row0 = _round_up(f0, 8)                                        # 8-aligned x segment
    h_rows = _round_up(num_trees * tree_dim, 8)                      # compact 8-aligned h segment
    dt_pad = _round_up(depth * num_trees + 1, 128)                   # compact lanes + ones lane

    layer_params = [prep_layer(p, l, num_trees=num_trees, depth=depth, tree_dim=tree_dim,
                               f0=f0, f_row0=f_row0, h_rows=h_rows, dt_pad=dt_pad)
                    for l, p in enumerate(raw_params)]
    expansion = build_expansion(depth, num_trees, dt_pad)

    kwargs = dict(num_layers=num_layers, num_trees=num_trees, depth=depth,
                  tree_dim=tree_dim, f0=f0, f_row0=f_row0, h_rows=h_rows,
                  dt_pad=dt_pad, block_b=512)
    try:
        out = jax.block_until_ready(
            node_backbone_forward(x, layer_params, expansion,
                                  single_buffer_params=True, **kwargs))
    except Exception:
        # pl.Buffered(1) single-buffering is a VMEM optimization only; fall back
        # to default double-buffering if this jax version rejects it.
        out = jax.block_until_ready(
            node_backbone_forward(x, layer_params, expansion,
                                  single_buffer_params=False, **kwargs))

    ref = backbone_ref(x, raw_params, num_trees, depth, tree_dim, num_layers)
    # Feature/response matmuls run MXU-native bf16 (f32 accumulate); the
    # reference is full-f32 (HIGHEST), so compare at a tolerance that covers
    # bf16 rounding while still catching logic bugs.
    np.testing.assert_allclose(np.asarray(out), np.asarray(ref), rtol=3e-2, atol=3e-2)
    assert out.shape == (B, num_layers * num_trees, tree_dim)
    print("KERNEL_OK")
</pallas_src>

<mosaic_0001>
module attributes {stable_mosaic.version = 11 : i64} {
  func.func @_node_dense_kernel(%arg0: i32, %arg1: memref<16x16xf32, #tpu.memory_space<vmem>>, %arg2: memref<128x512xbf16, #tpu.memory_space<vmem>>, %arg3: memref<16x128xbf16, #tpu.memory_space<vmem>>, %arg4: memref<1x128xf32, #tpu.memory_space<vmem>>, %arg5: memref<128x24xbf16, #tpu.memory_space<vmem>>, %arg6: memref<40x128xbf16, #tpu.memory_space<vmem>>, %arg7: memref<1x128xf32, #tpu.memory_space<vmem>>, %arg8: memref<128x24xbf16, #tpu.memory_space<vmem>>, %arg9: memref<16x128xf32, #tpu.memory_space<vmem>>, %arg10: memref<16x40xbf16, #tpu.memory_space<vmem>>) attributes {dimension_semantics = [#tpu.dimension_semantics<parallel>], iteration_bounds = array<i64: 2>, scalar_prefetch = 0 : i64, scratch_operands = 1 : i64, tpu.core_type = #tpu.core_type<tc>, window_params = [{transform_indices = @transform_0, window_bounds = array<i64: 16, 16>}, {pipeline_mode = #tpu.pipeline_mode<synchronous>, transform_indices = @transform_1, window_bounds = array<i64: 128, 512>}, {pipeline_mode = #tpu.pipeline_mode<synchronous>, transform_indices = @transform_2, window_bounds = array<i64: 16, 128>}, {pipeline_mode = #tpu.pipeline_mode<synchronous>, transform_indices = @transform_3, window_bounds = array<i64: 1, 128>}, {pipeline_mode = #tpu.pipeline_mode<synchronous>, transform_indices = @transform_4, window_bounds = array<i64: 128, 24>}, {pipeline_mode = #tpu.pipeline_mode<synchronous>, transform_indices = @transform_5, window_bounds = array<i64: 40, 128>}, {pipeline_mode = #tpu.pipeline_mode<synchronous>, transform_indices = @transform_6, window_bounds = array<i64: 1, 128>}, {pipeline_mode = #tpu.pipeline_mode<synchronous>, transform_indices = @transform_7, window_bounds = array<i64: 128, 24>}, {transform_indices = @transform_8, window_bounds = array<i64: 16, 128>}]} {
    %cst = arith.constant 0.000000e+00 : bf16
    %0 = vector.broadcast %cst : bf16 to vector<16x40xbf16>
    %c0 = arith.constant 0 : index
    %c0_0 = arith.constant 0 : index
    %1 = vector.load %arg10[%c0, %c0_0] : memref<16x40xbf16, #tpu.memory_space<vmem>>, vector<16x40xbf16>
    tpu.vector_store %arg10[%c0, %c0_0], %0 {strides = array<i32>} : memref<16x40xbf16, #tpu.memory_space<vmem>>, vector<16x40xbf16>,
    %c0_1 = arith.constant 0 : index
    %c0_2 = arith.constant 0 : index
    %2 = vector.load %arg1[%c0_1, %c0_2] : memref<16x16xf32, #tpu.memory_space<vmem>>, vector<16x16xf32>
    %3 = arith.truncf %2 : vector<16x16xf32> to vector<16x16xbf16>
    %c0_3 = arith.constant 0 : index
    %c0_4 = arith.constant 0 : index
    %4 = vector.load %arg10[%c0_3, %c0_4] : memref<16x40xbf16, #tpu.memory_space<vmem>>, vector<16x16xbf16>
    tpu.vector_store %arg10[%c0_3, %c0_4], %3 {strides = array<i32>} : memref<16x40xbf16, #tpu.memory_space<vmem>>, vector<16x16xbf16>,
    %cst_5 = arith.constant 0.000000e+00 : f32
    %5 = vector.broadcast %cst_5 : f32 to vector<16x80xf32>
    %c0_6 = arith.constant 0 : index
    %c48 = arith.constant 48 : index
    %6 = vector.load %arg9[%c0_6, %c48] : memref<16x128xf32, #tpu.memory_space<vmem>>, vector<16x80xf32>
    tpu.vector_store %arg9[%c0_6, %c48], %5 {strides = array<i32>} : memref<16x128xf32, #tpu.memory_space<vmem>>, vector<16x80xf32>,
    %c0_7 = arith.constant 0 : index
    %c0_8 = arith.constant 0 : index
    %7 = vector.load %arg2[%c0_7, %c0_8] : memref<128x512xbf16, #tpu.memory_space<vmem>>, vector<128x512xbf16>
    %c0_9 = arith.constant 0 : index
    %c0_10 = arith.constant 0 : index
    %8 = vector.load %arg10[%c0_9, %c0_10] : memref<16x40xbf16, #tpu.memory_space<vmem>>, vector<16x16xbf16>
    %c0_11 = arith.constant 0 : index
    %c0_12 = arith.constant 0 : index
    %9 = vector.load %arg3[%c0_11, %c0_12] : memref<16x128xbf16, #tpu.memory_space<vmem>>, vector<16x128xbf16>
    %cst_13 = arith.constant dense<0.000000e+00> : vector<16x128xf32>
    %10 = tpu.matmul %8, %9, %cst_13 {dimension_numbers = #tpu.dot_dimension_numbers<[1], [0], [0], [1], [0, 0, 1, 1], [], []>} : vector<16x16xbf16>, vector<16x128xbf16>, vector<16x128xf32> -> vector<16x128xf32>
    %c0_14 = arith.constant 0 : index
    %c0_15 = arith.constant 0 : index
    %11 = vector.load %arg4[%c0_14, %c0_15] : memref<1x128xf32, #tpu.memory_space<vmem>>, vector<1x128xf32>
    %12 = vector.broadcast %11 : vector<1x128xf32> to vector<16x128xf32>
    %13 = arith.subf %10, %12 : vector<16x128xf32>
    %14 = math.absf %13 : vector<16x128xf32>
    %cst_16 = arith.constant 0.000000e+00 : f32
    %15 = vector.broadcast %cst_16 : f32 to vector<16x128xf32>
    %16 = arith.cmpf oge, %13, %15 : vector<16x128xf32>
    %17 = arith.mulf %14, %14 : vector<16x128xf32>
    %cst_17 = arith.constant 8.000000e+00 : f32
    %18 = vector.broadcast %cst_17 : f32 to vector<16x128xf32>
    %19 = arith.subf %18, %17 : vector<16x128xf32>
    %cst_18 = arith.constant 0.000000e+00 : f32
    %20 = vector.broadcast %cst_18 : f32 to vector<16x128xf32>
    %21 = arith.maximumf %19, %20 : vector<16x128xf32>
    %22 = math.sqrt %21 : vector<16x128xf32>
    %23 = arith.addf %14, %22 : vector<16x128xf32>
    %cst_19 = arith.constant 5.000000e-01 : f32
    %24 = vector.broadcast %cst_19 : f32 to vector<16x128xf32>
    %25 = arith.mulf %23, %24 : vector<16x128xf32>
    %26 = arith.cmpf ole, %25, %14 : vector<16x128xf32>
    %cst_20 = arith.constant 2.000000e+00 : f32
    %27 = vector.broadcast %cst_20 : f32 to vector<16x128xf32>
    %28 = arith.select %26, %27, %25 : vector<16x128xi1>, vector<16x128xf32>
    %29 = arith.subf %28, %14 : vector<16x128xf32>
    %cst_21 = arith.constant 0.000000e+00 : f32
    %30 = vector.broadcast %cst_21 : f32 to vector<16x128xf32>
    %31 = arith.maximumf %29, %30 : vector<16x128xf32>
    %32 = arith.mulf %31, %31 : vector<16x128xf32>
    %cst_22 = arith.constant 2.500000e-01 : f32
    %33 = vector.broadcast %cst_22 : f32 to vector<16x128xf32>
    %34 = arith.mulf %33, %32 : vector<16x128xf32>
    %cst_23 = arith.constant 1.000000e+00 : f32
    %35 = vector.broadcast %cst_23 : f32 to vector<16x128xf32>
    %36 = arith.subf %35, %34 : vector<16x128xf32>
    %37 = arith.select %16, %36, %34 : vector<16x128xi1>, vector<16x128xf32>
    %38 = arith.truncf %37 : vector<16x128xf32> to vector<16x128xbf16>
    %39 = arith.extf %38 : vector<16x128xbf16> to vector<16x128xf32>
    %40 = arith.subf %37, %39 : vector<16x128xf32>
    %41 = arith.truncf %40 : vector<16x128xf32> to vector<16x128xbf16>
    %cst_24 = arith.constant dense<0.000000e+00> : vector<16x512xf32>
    %42 = tpu.matmul %38, %7, %cst_24 {dimension_numbers = #tpu.dot_dimension_numbers<[1], [0], [0], [1], [0, 0, 1, 1], [], []>} : vector<16x128xbf16>, vector<128x512xbf16>, vector<16x512xf32> -> vector<16x512xf32>
    %cst_25 = arith.constant dense<0.000000e+00> : vector<16x512xf32>
    %43 = tpu.matmul %41, %7, %cst_25 {dimension_numbers = #tpu.dot_dimension_numbers<[1], [0], [0], [1], [0, 0, 1, 1], [], []>} : vector<16x128xbf16>, vector<128x512xbf16>, vector<16x512xf32> -> vector<16x512xf32>
    %44 = arith.addf %42, %43 : vector<16x512xf32>
    %45 = vector.extract_strided_slice %44 {offsets = [0, 0], sizes = [16, 128], strides = [1, 1]} : vector<16x512xf32> to vector<16x128xf32>
    %46 = vector.extract_strided_slice %44 {offsets = [0, 128], sizes = [16, 128], strides = [1, 1]} : vector<16x512xf32> to vector<16x128xf32>
    %47 = arith.mulf %45, %46 : vector<16x128xf32>
    %48 = vector.extract_strided_slice %44 {offsets = [0, 256], sizes = [16, 128], strides = [1, 1]} : vector<16x512xf32> to vector<16x128xf32>
    %49 = arith.mulf %47, %48 : vector<16x128xf32>
    %50 = vector.extract_strided_slice %44 {offsets = [0, 384], sizes = [16, 128], strides = [1, 1]} : vector<16x512xf32> to vector<16x128xf32>
    %51 = arith.mulf %49, %50 : vector<16x128xf32>
    %52 = arith.truncf %51 : vector<16x128xf32> to vector<16x128xbf16>
    %c0_26 = arith.constant 0 : index
    %c0_27 = arith.constant 0 : index
    %53 = vector.load %arg5[%c0_26, %c0_27] : memref<128x24xbf16, #tpu.memory_space<vmem>>, vector<128x24xbf16>
    %cst_28 = arith.constant dense<0.000000e+00> : vector<16x24xf32>
    %54 = tpu.matmul %52, %53, %cst_28 {dimension_numbers = #tpu.dot_dimension_numbers<[1], [0], [0], [1], [0, 0, 1, 1], [], []>} : vector<16x128xbf16>, vector<128x24xbf16>, vector<16x24xf32> -> vector<16x24xf32>
    %c0_29 = arith.constant 0 : index
    %c0_30 = arith.constant 0 : index
    %55 = vector.load %arg9[%c0_29, %c0_30] : memref<16x128xf32, #tpu.memory_space<vmem>>, vector<16x24xf32>
    tpu.vector_store %arg9[%c0_29, %c0_30], %54 {strides = array<i32>} : memref<16x128xf32, #tpu.memory_space<vmem>>, vector<16x24xf32>,
    %56 = arith.truncf %54 : vector<16x24xf32> to vector<16x24xbf16>
    %c0_31 = arith.constant 0 : index
    %c16 = arith.constant 16 : index
    %57 = vector.load %arg10[%c0_31, %c16] : memref<16x40xbf16, #tpu.memory_space<vmem>>, vector<16x24xbf16>
    tpu.vector_store %arg10[%c0_31, %c16], %56 {strides = array<i32>} : memref<16x40xbf16, #tpu.memory_space<vmem>>, vector<16x24xbf16>,
    %c0_32 = arith.constant 0 : index
    %c0_33 = arith.constant 0 : index
    %58 = vector.load %arg10[%c0_32, %c0_33] : memref<16x40xbf16, #tpu.memory_space<vmem>>, vector<16x40xbf16>
    %c0_34 = arith.constant 0 : index
    %c0_35 = arith.constant 0 : index
    %59 = vector.load %arg6[%c0_34, %c0_35] : memref<40x128xbf16, #tpu.memory_space<vmem>>, vector<40x128xbf16>
    %cst_36 = arith.constant dense<0.000000e+00> : vector<16x128xf32>
    %60 = tpu.matmul %58, %59, %cst_36 {dimension_numbers = #tpu.dot_dimension_numbers<[1], [0], [0], [1], [0, 0, 1, 1], [], []>} : vector<16x40xbf16>, vector<40x128xbf16>, vector<16x128xf32> -> vector<16x128xf32>
    %c0_37 = arith.constant 0 : index
    %c0_38 = arith.constant 0 : index
    %61 = vector.load %arg7[%c0_37, %c0_38] : memref<1x128xf32, #tpu.memory_space<vmem>>, vector<1x128xf32>
    %62 = vector.broadcast %61 : vector<1x128xf32> to vector<16x128xf32>
    %63 = arith.subf %60, %62 : vector<16x128xf32>
    %64 = math.absf %63 : vector<16x128xf32>
    %cst_39 = arith.constant 0.000000e+00 : f32
    %65 = vector.broadcast %cst_39 : f32 to vector<16x128xf32>
    %66 = arith.cmpf oge, %63, %65 : vector<16x128xf32>
    %67 = arith.mulf %64, %64 : vector<16x128xf32>
    %cst_40 = arith.constant 8.000000e+00 : f32
    %68 = vector.broadcast %cst_40 : f32 to vector<16x128xf32>
    %69 = arith.subf %68, %67 : vector<16x128xf32>
    %cst_41 = arith.constant 0.000000e+00 : f32
    %70 = vector.broadcast %cst_41 : f32 to vector<16x128xf32>
    %71 = arith.maximumf %69, %70 : vector<16x128xf32>
    %72 = math.sqrt %71 : vector<16x128xf32>
    %73 = arith.addf %64, %72 : vector<16x128xf32>
    %cst_42 = arith.constant 5.000000e-01 : f32
    %74 = vector.broadcast %cst_42 : f32 to vector<16x128xf32>
    %75 = arith.mulf %73, %74 : vector<16x128xf32>
    %76 = arith.cmpf ole, %75, %64 : vector<16x128xf32>
    %cst_43 = arith.constant 2.000000e+00 : f32
    %77 = vector.broadcast %cst_43 : f32 to vector<16x128xf32>
    %78 = arith.select %76, %77, %75 : vector<16x128xi1>, vector<16x128xf32>
    %79 = arith.subf %78, %64 : vector<16x128xf32>
    %cst_44 = arith.constant 0.000000e+00 : f32
    %80 = vector.broadcast %cst_44 : f32 to vector<16x128xf32>
    %81 = arith.maximumf %79, %80 : vector<16x128xf32>
    %82 = arith.mulf %81, %81 : vector<16x128xf32>
    %cst_45 = arith.constant 2.500000e-01 : f32
    %83 = vector.broadcast %cst_45 : f32 to vector<16x128xf32>
    %84 = arith.mulf %83, %82 : vector<16x128xf32>
    %cst_46 = arith.constant 1.000000e+00 : f32
    %85 = vector.broadcast %cst_46 : f32 to vector<16x128xf32>
    %86 = arith.subf %85, %84 : vector<16x128xf32>
    %87 = arith.select %66, %86, %84 : vector<16x128xi1>, vector<16x128xf32>
    %88 = arith.truncf %87 : vector<16x128xf32> to vector<16x128xbf16>
    %89 = arith.extf %88 : vector<16x128xbf16> to vector<16x128xf32>
    %90 = arith.subf %87, %89 : vector<16x128xf32>
    %91 = arith.truncf %90 : vector<16x128xf32> to vector<16x128xbf16>
    %cst_47 = arith.constant dense<0.000000e+00> : vector<16x512xf32>
    %92 = tpu.matmul %88, %7, %cst_47 {dimension_numbers = #tpu.dot_dimension_numbers<[1], [0], [0], [1], [0, 0, 1, 1], [], []>} : vector<16x128xbf16>, vector<128x512xbf16>, vector<16x512xf32> -> vector<16x512xf32>
    %cst_48 = arith.constant dense<0.000000e+00> : vector<16x512xf32>
    %93 = tpu.matmul %91, %7, %cst_48 {dimension_numbers = #tpu.dot_dimension_numbers<[1], [0], [0], [1], [0, 0, 1, 1], [], []>} : vector<16x128xbf16>, vector<128x512xbf16>, vector<16x512xf32> -> vector<16x512xf32>
    %94 = arith.addf %92, %93 : vector<16x512xf32>
    %95 = vector.extract_strided_slice %94 {offsets = [0, 0], sizes = [16, 128], strides = [1, 1]} : vector<16x512xf32> to vector<16x128xf32>
    %96 = vector.extract_strided_slice %94 {offsets = [0, 128], sizes = [16, 128], strides = [1, 1]} : vector<16x512xf32> to vector<16x128xf32>
    %97 = arith.mulf %95, %96 : vector<16x128xf32>
    %98 = vector.extract_strided_slice %94 {offsets = [0, 256], sizes = [16, 128], strides = [1, 1]} : vector<16x512xf32> to vector<16x128xf32>
    %99 = arith.mulf %97, %98 : vector<16x128xf32>
    %100 = vector.extract_strided_slice %94 {offsets = [0, 384], sizes = [16, 128], strides = [1, 1]} : vector<16x512xf32> to vector<16x128xf32>
    %101 = arith.mulf %99, %100 : vector<16x128xf32>
    %102 = arith.truncf %101 : vector<16x128xf32> to vector<16x128xbf16>
    %c0_49 = arith.constant 0 : index
    %c0_50 = arith.constant 0 : index
    %103 = vector.load %arg8[%c0_49, %c0_50] : memref<128x24xbf16, #tpu.memory_space<vmem>>, vector<128x24xbf16>
    %cst_51 = arith.constant dense<0.000000e+00> : vector<16x24xf32>
    %104 = tpu.matmul %102, %103, %cst_51 {dimension_numbers = #tpu.dot_dimension_numbers<[1], [0], [0], [1], [0, 0, 1, 1], [], []>} : vector<16x128xbf16>, vector<128x24xbf16>, vector<16x24xf32> -> vector<16x24xf32>
    %c0_52 = arith.constant 0 : index
    %c24 = arith.constant 24 : index
    %105 = vector.load %arg9[%c0_52, %c24] : memref<16x128xf32, #tpu.memory_space<vmem>>, vector<16x24xf32>
    tpu.vector_store %arg9[%c0_52, %c24], %104 {strides = array<i32>} : memref<16x128xf32, #tpu.memory_space<vmem>>, vector<16x24xf32>,
    return
  }
  func.func @transform_0(%arg0: i32) -> (i32, i32) {
    %c0_i32 = arith.constant 0 : i32
    %c0_i32_0 = arith.constant 0 : i32
    return %arg0, %c0_i32 : i32, i32
  }
  func.func @transform_1(%arg0: i32) -> (i32, i32) {
    %c0_i32 = arith.constant 0 : i32
    %c0_i32_0 = arith.constant 0 : i32
    %c0_i32_1 = arith.constant 0 : i32
    return %c0_i32, %c0_i32_0 : i32, i32
  }
  func.func @transform_2(%arg0: i32) -> (i32, i32) {
    %c0_i32 = arith.constant 0 : i32
    %c0_i32_0 = arith.constant 0 : i32
    %c0_i32_1 = arith.constant 0 : i32
    return %c0_i32, %c0_i32_0 : i32, i32
  }
  func.func @transform_3(%arg0: i32) -> (i32, i32) {
    %c0_i32 = arith.constant 0 : i32
    %c0_i32_0 = arith.constant 0 : i32
    %c0_i32_1 = arith.constant 0 : i32
    return %c0_i32, %c0_i32_0 : i32, i32
  }
  func.func @transform_4(%arg0: i32) -> (i32, i32) {
    %c0_i32 = arith.constant 0 : i32
    %c0_i32_0 = arith.constant 0 : i32
    %c0_i32_1 = arith.constant 0 : i32
    return %c0_i32, %c0_i32_0 : i32, i32
  }
  func.func @transform_5(%arg0: i32) -> (i32, i32) {
    %c0_i32 = arith.constant 0 : i32
    %c0_i32_0 = arith.constant 0 : i32
    %c0_i32_1 = arith.constant 0 : i32
    return %c0_i32, %c0_i32_0 : i32, i32
  }
  func.func @transform_6(%arg0: i32) -> (i32, i32) {
    %c0_i32 = arith.constant 0 : i32
    %c0_i32_0 = arith.constant 0 : i32
    %c0_i32_1 = arith.constant 0 : i32
    return %c0_i32, %c0_i32_0 : i32, i32
  }
  func.func @transform_7(%arg0: i32) -> (i32, i32) {
    %c0_i32 = arith.constant 0 : i32
    %c0_i32_0 = arith.constant 0 : i32
    %c0_i32_1 = arith.constant 0 : i32
    return %c0_i32, %c0_i32_0 : i32, i32
  }
  func.func @transform_8(%arg0: i32) -> (i32, i32) {
    %c0_i32 = arith.constant 0 : i32
    %c0_i32_0 = arith.constant 0 : i32
    return %arg0, %c0_i32 : i32, i32
  }
}

module attributes {stable_mosaic.version = 11 : i64} {
  func.func @_node_dense_kernel(%arg0: i32, %arg1: memref<16x16xf32, #tpu.memory_space<vmem>>, %arg2: memref<128x512xbf16, #tpu.memory_space<vmem>>, %arg3: memref<16x128xbf16, #tpu.memory_space<vmem>>, %arg4: memref<1x128xf32, #tpu.memory_space<vmem>>, %arg5: memref<128x24xbf16, #tpu.memory_space<vmem>>, %arg6: memref<40x128xbf16, #tpu.memory_space<vmem>>, %arg7: memref<1x128xf32, #tpu.memory_space<vmem>>, %arg8: memref<128x24xbf16, #tpu.memory_space<vmem>>, %arg9: memref<16x128xf32, #tpu.memory_space<vmem>>, %arg10: memref<16x40xbf16, #tpu.memory_space<vmem>>) attributes {dimension_semantics = [#tpu.dimension_semantics<parallel>], iteration_bounds = array<i64: 2>, scalar_prefetch = 0 : i64, scratch_operands = 1 : i64, tpu.core_type = #tpu.core_type<tc>, window_params = [{transform_indices = @transform_0, window_bounds = array<i64: 16, 16>}, {pipeline_mode = #tpu.pipeline_mode<synchronous>, transform_indices = @transform_1, window_bounds = array<i64: 128, 512>}, {pipeline_mode = #tpu.pipeline_mode<synchronous>, transform_indices = @transform_2, window_bounds = array<i64: 16, 128>}, {pipeline_mode = #tpu.pipeline_mode<synchronous>, transform_indices = @transform_3, window_bounds = array<i64: 1, 128>}, {pipeline_mode = #tpu.pipeline_mode<synchronous>, transform_indices = @transform_4, window_bounds = array<i64: 128, 24>}, {pipeline_mode = #tpu.pipeline_mode<synchronous>, transform_indices = @transform_5, window_bounds = array<i64: 40, 128>}, {pipeline_mode = #tpu.pipeline_mode<synchronous>, transform_indices = @transform_6, window_bounds = array<i64: 1, 128>}, {pipeline_mode = #tpu.pipeline_mode<synchronous>, transform_indices = @transform_7, window_bounds = array<i64: 128, 24>}, {transform_indices = @transform_8, window_bounds = array<i64: 16, 128>}]} {
    %cst = arith.constant 0.000000e+00 : bf16
    %0 = vector.broadcast %cst : bf16 to vector<16x40xbf16>
    %c0 = arith.constant 0 : index
    %c0_0 = arith.constant 0 : index
    %1 = vector.load %arg10[%c0, %c0_0] : memref<16x40xbf16, #tpu.memory_space<vmem>>, vector<16x40xbf16>
    tpu.vector_store %arg10[%c0, %c0_0], %0 {strides = array<i32>} : memref<16x40xbf16, #tpu.memory_space<vmem>>, vector<16x40xbf16>,
    %c0_1 = arith.constant 0 : index
    %c0_2 = arith.constant 0 : index
    %2 = vector.load %arg1[%c0_1, %c0_2] : memref<16x16xf32, #tpu.memory_space<vmem>>, vector<16x16xf32>
    %3 = arith.truncf %2 : vector<16x16xf32> to vector<16x16xbf16>
    %c0_3 = arith.constant 0 : index
    %c0_4 = arith.constant 0 : index
    %4 = vector.load %arg10[%c0_3, %c0_4] : memref<16x40xbf16, #tpu.memory_space<vmem>>, vector<16x16xbf16>
    tpu.vector_store %arg10[%c0_3, %c0_4], %3 {strides = array<i32>} : memref<16x40xbf16, #tpu.memory_space<vmem>>, vector<16x16xbf16>,
    %cst_5 = arith.constant 0.000000e+00 : f32
    %5 = vector.broadcast %cst_5 : f32 to vector<16x80xf32>
    %c0_6 = arith.constant 0 : index
    %c48 = arith.constant 48 : index
    %6 = vector.load %arg9[%c0_6, %c48] : memref<16x128xf32, #tpu.memory_space<vmem>>, vector<16x80xf32>
    tpu.vector_store %arg9[%c0_6, %c48], %5 {strides = array<i32>} : memref<16x128xf32, #tpu.memory_space<vmem>>, vector<16x80xf32>,
    %c0_7 = arith.constant 0 : index
    %c0_8 = arith.constant 0 : index
    %7 = vector.load %arg2[%c0_7, %c0_8] : memref<128x512xbf16, #tpu.memory_space<vmem>>, vector<128x512xbf16>
    %c0_9 = arith.constant 0 : index
    %c0_10 = arith.constant 0 : index
    %8 = vector.load %arg10[%c0_9, %c0_10] : memref<16x40xbf16, #tpu.memory_space<vmem>>, vector<16x16xbf16>
    %c0_11 = arith.constant 0 : index
    %c0_12 = arith.constant 0 : index
    %9 = vector.load %arg3[%c0_11, %c0_12] : memref<16x128xbf16, #tpu.memory_space<vmem>>, vector<16x128xbf16>
    %cst_13 = arith.constant dense<0.000000e+00> : vector<16x128xf32>
    %10 = tpu.matmul %8, %9, %cst_13 {dimension_numbers = #tpu.dot_dimension_numbers<[1], [0], [0], [1], [0, 0, 1, 1], [], []>} : vector<16x16xbf16>, vector<16x128xbf16>, vector<16x128xf32> -> vector<16x128xf32>
    %c0_14 = arith.constant 0 : index
    %c0_15 = arith.constant 0 : index
    %11 = vector.load %arg4[%c0_14, %c0_15] : memref<1x128xf32, #tpu.memory_space<vmem>>, vector<1x128xf32>
    %12 = vector.broadcast %11 : vector<1x128xf32> to vector<16x128xf32>
    %13 = arith.subf %10, %12 : vector<16x128xf32>
    %14 = math.absf %13 : vector<16x128xf32>
    %cst_16 = arith.constant 0.000000e+00 : f32
    %15 = vector.broadcast %cst_16 : f32 to vector<16x128xf32>
    %16 = arith.cmpf oge, %13, %15 : vector<16x128xf32>
    %17 = arith.mulf %14, %14 : vector<16x128xf32>
    %cst_17 = arith.constant 8.000000e+00 : f32
    %18 = vector.broadcast %cst_17 : f32 to vector<16x128xf32>
    %19 = arith.subf %18, %17 : vector<16x128xf32>
    %cst_18 = arith.constant 0.000000e+00 : f32
    %20 = vector.broadcast %cst_18 : f32 to vector<16x128xf32>
    %21 = arith.maximumf %19, %20 : vector<16x128xf32>
    %22 = math.sqrt %21 : vector<16x128xf32>
    %23 = arith.addf %14, %22 : vector<16x128xf32>
    %cst_19 = arith.constant 5.000000e-01 : f32
    %24 = vector.broadcast %cst_19 : f32 to vector<16x128xf32>
    %25 = arith.mulf %23, %24 : vector<16x128xf32>
    %26 = arith.cmpf ole, %25, %14 : vector<16x128xf32>
    %cst_20 = arith.constant 2.000000e+00 : f32
    %27 = vector.broadcast %cst_20 : f32 to vector<16x128xf32>
    %28 = arith.select %26, %27, %25 : vector<16x128xi1>, vector<16x128xf32>
    %29 = arith.subf %28, %14 : vector<16x128xf32>
    %cst_21 = arith.constant 0.000000e+00 : f32
    %30 = vector.broadcast %cst_21 : f32 to vector<16x128xf32>
    %31 = arith.maximumf %29, %30 : vector<16x128xf32>
    %32 = arith.mulf %31, %31 : vector<16x128xf32>
    %cst_22 = arith.constant 2.500000e-01 : f32
    %33 = vector.broadcast %cst_22 : f32 to vector<16x128xf32>
    %34 = arith.mulf %33, %32 : vector<16x128xf32>
    %cst_23 = arith.constant 1.000000e+00 : f32
    %35 = vector.broadcast %cst_23 : f32 to vector<16x128xf32>
    %36 = arith.subf %35, %34 : vector<16x128xf32>
    %37 = arith.select %16, %36, %34 : vector<16x128xi1>, vector<16x128xf32>
    %38 = arith.truncf %37 : vector<16x128xf32> to vector<16x128xbf16>
    %39 = arith.extf %38 : vector<16x128xbf16> to vector<16x128xf32>
    %40 = arith.subf %37, %39 : vector<16x128xf32>
    %41 = arith.truncf %40 : vector<16x128xf32> to vector<16x128xbf16>
    %cst_24 = arith.constant dense<0.000000e+00> : vector<16x512xf32>
    %42 = tpu.matmul %38, %7, %cst_24 {dimension_numbers = #tpu.dot_dimension_numbers<[1], [0], [0], [1], [0, 0, 1, 1], [], []>} : vector<16x128xbf16>, vector<128x512xbf16>, vector<16x512xf32> -> vector<16x512xf32>
    %cst_25 = arith.constant dense<0.000000e+00> : vector<16x512xf32>
    %43 = tpu.matmul %41, %7, %cst_25 {dimension_numbers = #tpu.dot_dimension_numbers<[1], [0], [0], [1], [0, 0, 1, 1], [], []>} : vector<16x128xbf16>, vector<128x512xbf16>, vector<16x512xf32> -> vector<16x512xf32>
    %44 = arith.addf %42, %43 : vector<16x512xf32>
    %45 = vector.extract_strided_slice %44 {offsets = [0, 0], sizes = [16, 128], strides = [1, 1]} : vector<16x512xf32> to vector<16x128xf32>
    %46 = vector.extract_strided_slice %44 {offsets = [0, 128], sizes = [16, 128], strides = [1, 1]} : vector<16x512xf32> to vector<16x128xf32>
    %47 = arith.mulf %45, %46 : vector<16x128xf32>
    %48 = vector.extract_strided_slice %44 {offsets = [0, 256], sizes = [16, 128], strides = [1, 1]} : vector<16x512xf32> to vector<16x128xf32>
    %49 = arith.mulf %47, %48 : vector<16x128xf32>
    %50 = vector.extract_strided_slice %44 {offsets = [0, 384], sizes = [16, 128], strides = [1, 1]} : vector<16x512xf32> to vector<16x128xf32>
    %51 = arith.mulf %49, %50 : vector<16x128xf32>
    %52 = arith.truncf %51 : vector<16x128xf32> to vector<16x128xbf16>
    %c0_26 = arith.constant 0 : index
    %c0_27 = arith.constant 0 : index
    %53 = vector.load %arg5[%c0_26, %c0_27] : memref<128x24xbf16, #tpu.memory_space<vmem>>, vector<128x24xbf16>
    %cst_28 = arith.constant dense<0.000000e+00> : vector<16x24xf32>
    %54 = tpu.matmul %52, %53, %cst_28 {dimension_numbers = #tpu.dot_dimension_numbers<[1], [0], [0], [1], [0, 0, 1, 1], [], []>} : vector<16x128xbf16>, vector<128x24xbf16>, vector<16x24xf32> -> vector<16x24xf32>
    %c0_29 = arith.constant 0 : index
    %c0_30 = arith.constant 0 : index
    %55 = vector.load %arg9[%c0_29, %c0_30] : memref<16x128xf32, #tpu.memory_space<vmem>>, vector<16x24xf32>
    tpu.vector_store %arg9[%c0_29, %c0_30], %54 {strides = array<i32>} : memref<16x128xf32, #tpu.memory_space<vmem>>, vector<16x24xf32>,
    %56 = arith.truncf %54 : vector<16x24xf32> to vector<16x24xbf16>
    %c0_31 = arith.constant 0 : index
    %c16 = arith.constant 16 : index
    %57 = vector.load %arg10[%c0_31, %c16] : memref<16x40xbf16, #tpu.memory_space<vmem>>, vector<16x24xbf16>
    tpu.vector_store %arg10[%c0_31, %c16], %56 {strides = array<i32>} : memref<16x40xbf16, #tpu.memory_space<vmem>>, vector<16x24xbf16>,
    %c0_32 = arith.constant 0 : index
    %c0_33 = arith.constant 0 : index
    %58 = vector.load %arg10[%c0_32, %c0_33] : memref<16x40xbf16, #tpu.memory_space<vmem>>, vector<16x40xbf16>
    %c0_34 = arith.constant 0 : index
    %c0_35 = arith.constant 0 : index
    %59 = vector.load %arg6[%c0_34, %c0_35] : memref<40x128xbf16, #tpu.memory_space<vmem>>, vector<40x128xbf16>
    %cst_36 = arith.constant dense<0.000000e+00> : vector<16x128xf32>
    %60 = tpu.matmul %58, %59, %cst_36 {dimension_numbers = #tpu.dot_dimension_numbers<[1], [0], [0], [1], [0, 0, 1, 1], [], []>} : vector<16x40xbf16>, vector<40x128xbf16>, vector<16x128xf32> -> vector<16x128xf32>
    %c0_37 = arith.constant 0 : index
    %c0_38 = arith.constant 0 : index
    %61 = vector.load %arg7[%c0_37, %c0_38] : memref<1x128xf32, #tpu.memory_space<vmem>>, vector<1x128xf32>
    %62 = vector.broadcast %61 : vector<1x128xf32> to vector<16x128xf32>
    %63 = arith.subf %60, %62 : vector<16x128xf32>
    %64 = math.absf %63 : vector<16x128xf32>
    %cst_39 = arith.constant 0.000000e+00 : f32
    %65 = vector.broadcast %cst_39 : f32 to vector<16x128xf32>
    %66 = arith.cmpf oge, %63, %65 : vector<16x128xf32>
    %67 = arith.mulf %64, %64 : vector<16x128xf32>
    %cst_40 = arith.constant 8.000000e+00 : f32
    %68 = vector.broadcast %cst_40 : f32 to vector<16x128xf32>
    %69 = arith.subf %68, %67 : vector<16x128xf32>
    %cst_41 = arith.constant 0.000000e+00 : f32
    %70 = vector.broadcast %cst_41 : f32 to vector<16x128xf32>
    %71 = arith.maximumf %69, %70 : vector<16x128xf32>
    %72 = math.sqrt %71 : vector<16x128xf32>
    %73 = arith.addf %64, %72 : vector<16x128xf32>
    %cst_42 = arith.constant 5.000000e-01 : f32
    %74 = vector.broadcast %cst_42 : f32 to vector<16x128xf32>
    %75 = arith.mulf %73, %74 : vector<16x128xf32>
    %76 = arith.cmpf ole, %75, %64 : vector<16x128xf32>
    %cst_43 = arith.constant 2.000000e+00 : f32
    %77 = vector.broadcast %cst_43 : f32 to vector<16x128xf32>
    %78 = arith.select %76, %77, %75 : vector<16x128xi1>, vector<16x128xf32>
    %79 = arith.subf %78, %64 : vector<16x128xf32>
    %cst_44 = arith.constant 0.000000e+00 : f32
    %80 = vector.broadcast %cst_44 : f32 to vector<16x128xf32>
    %81 = arith.maximumf %79, %80 : vector<16x128xf32>
    %82 = arith.mulf %81, %81 : vector<16x128xf32>
    %cst_45 = arith.constant 2.500000e-01 : f32
    %83 = vector.broadcast %cst_45 : f32 to vector<16x128xf32>
    %84 = arith.mulf %83, %82 : vector<16x128xf32>
    %cst_46 = arith.constant 1.000000e+00 : f32
    %85 = vector.broadcast %cst_46 : f32 to vector<16x128xf32>
    %86 = arith.subf %85, %84 : vector<16x128xf32>
    %87 = arith.select %66, %86, %84 : vector<16x128xi1>, vector<16x128xf32>
    %88 = arith.truncf %87 : vector<16x128xf32> to vector<16x128xbf16>
    %89 = arith.extf %88 : vector<16x128xbf16> to vector<16x128xf32>
    %90 = arith.subf %87, %89 : vector<16x128xf32>
    %91 = arith.truncf %90 : vector<16x128xf32> to vector<16x128xbf16>
    %cst_47 = arith.constant dense<0.000000e+00> : vector<16x512xf32>
    %92 = tpu.matmul %88, %7, %cst_47 {dimension_numbers = #tpu.dot_dimension_numbers<[1], [0], [0], [1], [0, 0, 1, 1], [], []>} : vector<16x128xbf16>, vector<128x512xbf16>, vector<16x512xf32> -> vector<16x512xf32>
    %cst_48 = arith.constant dense<0.000000e+00> : vector<16x512xf32>
    %93 = tpu.matmul %91, %7, %cst_48 {dimension_numbers = #tpu.dot_dimension_numbers<[1], [0], [0], [1], [0, 0, 1, 1], [], []>} : vector<16x128xbf16>, vector<128x512xbf16>, vector<16x512xf32> -> vector<16x512xf32>
    %94 = arith.addf %92, %93 : vector<16x512xf32>
    %95 = vector.extract_strided_slice %94 {offsets = [0, 0], sizes = [16, 128], strides = [1, 1]} : vector<16x512xf32> to vector<16x128xf32>
    %96 = vector.extract_strided_slice %94 {offsets = [0, 128], sizes = [16, 128], strides = [1, 1]} : vector<16x512xf32> to vector<16x128xf32>
    %97 = arith.mulf %95, %96 : vector<16x128xf32>
    %98 = vector.extract_strided_slice %94 {offsets = [0, 256], sizes = [16, 128], strides = [1, 1]} : vector<16x512xf32> to vector<16x128xf32>
    %99 = arith.mulf %97, %98 : vector<16x128xf32>
    %100 = vector.extract_strided_slice %94 {offsets = [0, 384], sizes = [16, 128], strides = [1, 1]} : vector<16x512xf32> to vector<16x128xf32>
    %101 = arith.mulf %99, %100 : vector<16x128xf32>
    %102 = arith.truncf %101 : vector<16x128xf32> to vector<16x128xbf16>
    %c0_49 = arith.constant 0 : index
    %c0_50 = arith.constant 0 : index
    %103 = vector.load %arg8[%c0_49, %c0_50] : memref<128x24xbf16, #tpu.memory_space<vmem>>, vector<128x24xbf16>
    %cst_51 = arith.constant dense<0.000000e+00> : vector<16x24xf32>
    %104 = tpu.matmul %102, %103, %cst_51 {dimension_numbers = #tpu.dot_dimension_numbers<[1], [0], [0], [1], [0, 0, 1, 1], [], []>} : vector<16x128xbf16>, vector<128x24xbf16>, vector<16x24xf32> -> vector<16x24xf32>
    %c0_52 = arith.constant 0 : index
    %c24 = arith.constant 24 : index
    %105 = vector.load %arg9[%c0_52, %c24] : memref<16x128xf32, #tpu.memory_space<vmem>>, vector<16x24xf32>
    tpu.vector_store %arg9[%c0_52, %c24], %104 {strides = array<i32>} : memref<16x128xf32, #tpu.memory_space<vmem>>, vector<16x24xf32>,
    return
  }
  func.func @transform_0(%arg0: i32) -> (i32, i32) {
    %c0_i32 = arith.constant 0 : i32
    %c0_i32_0 = arith.constant 0 : i32
    return %arg0, %c0_i32 : i32, i32
  }
  func.func @transform_1(%arg0: i32) -> (i32, i32) {
    %c0_i32 = arith.constant 0 : i32
    %c0_i32_0 = arith.constant 0 : i32
    %c0_i32_1 = arith.constant 0 : i32
    return %c0_i32, %c0_i32_0 : i32, i32
  }
  func.func @transform_2(%arg0: i32) -> (i32, i32) {
    %c0_i32 = arith.constant 0 : i32
    %c0_i32_0 = arith.constant 0 : i32
    %c0_i32_1 = arith.constant 0 : i32
    return %c0_i32, %c0_i32_0 : i32, i32
  }
  func.func @transform_3(%arg0: i32) -> (i32, i32) {
    %c0_i32 = arith.constant 0 : i32
    %c0_i32_0 = arith.constant 0 : i32
    %c0_i32_1 = arith.constant 0 : i32
    return %c0_i32, %c0_i32_0 : i32, i32
  }
  func.func @transform_4(%arg0: i32) -> (i32, i32) {
    %c0_i32 = arith.constant 0 : i32
    %c0_i32_0 = arith.constant 0 : i32
    %c0_i32_1 = arith.constant 0 : i32
    return %c0_i32, %c0_i32_0 : i32, i32
  }
  func.func @transform_5(%arg0: i32) -> (i32, i32) {
    %c0_i32 = arith.constant 0 : i32
    %c0_i32_0 = arith.constant 0 : i32
    %c0_i32_1 = arith.constant 0 : i32
    return %c0_i32, %c0_i32_0 : i32, i32
  }
  func.func @transform_6(%arg0: i32) -> (i32, i32) {
    %c0_i32 = arith.constant 0 : i32
    %c0_i32_0 = arith.constant 0 : i32
    %c0_i32_1 = arith.constant 0 : i32
    return %c0_i32, %c0_i32_0 : i32, i32
  }
  func.func @transform_7(%arg0: i32) -> (i32, i32) {
    %c0_i32 = arith.constant 0 : i32
    %c0_i32_0 = arith.constant 0 : i32
    %c0_i32_1 = arith.constant 0 : i32
    return %c0_i32, %c0_i32_0 : i32, i32
  }
  func.func @transform_8(%arg0: i32) -> (i32, i32) {
    %c0_i32 = arith.constant 0 : i32
    %c0_i32_0 = arith.constant 0 : i32
    return %arg0, %c0_i32 : i32, i32
  }
}

</mosaic_0001>

<bundles_post_ra>
// kernel: tpu_custom_call.1
= control target key start
LH: loop header
LB: loop body
LE: loop exit
PB: predicated region body
PF: predicated region fallthrough
CT: control target
= control target key end

     0   :  { %13 = vsyncpa [#allocation4], 0  ;;  %s2345_s0 = inlined_call_operand.vmem [shape: f32[32,16], index: 0, kind: input, shape index: {}]   ;;  %s2346_s1 = inlined_call_operand.hbm [shape: bf16[128,512], index: 1, kind: input, shape index: {}]   ;;  %s2347_s2 = inlined_call_operand.vmem [shape: bf16[16,128], index: 2, kind: input, shape index: {}]   ;;  %s2348_s3 = inlined_call_operand.vmem [shape: f32[1,128], index: 3, kind: input, shape index: {}]   ;;  %s2349_s4 = inlined_call_operand.vmem [shape: bf16[128,24], index: 4, kind: input, shape index: {}]   ;;  %s2350_s5 = inlined_call_operand.vmem [shape: bf16[40,128], index: 5, kind: input, shape index: {}]   ;;  %s2351_s6 = inlined_call_operand.vmem [shape: f32[1,128], index: 6, kind: input, shape index: {}]   ;;  %s2352_s7 = inlined_call_operand.vmem [shape: bf16[128,24], index: 7, kind: input, shape index: {}]   ;;  %s2353_s8 = inlined_call_operand.hbm [shape: f32[32,128], index: 8, kind: output, shape index: {}]  }
   0x1   :  { %14 = vsyncpa [#allocation5], 0 }
   0x2   :  { %16 = vsyncpa [#allocation5 + $0x1], 0  ;;  %s1896_s27 = smov 0   ;;  %s1898_s28 = smov 0  }
   0x3   :  { %s1900_s29 = smov 0   ;;  %s1902_s30 = smov 0  }
   0x4 LB: > { %s1917_s9 = sadd.s32 4294967295, %s1838_s30   ;;  %s1442_s10 = sadd.s32 4294967294, %s1838_s30   ;;  %s1838_s30 = sphi %s1902_s30, %s2369_s30   ;;  %s1834_s29 = sphi %s1900_s29, %s2368_s29   ;;  %s1830_s28 = sphi %s1898_s28, %s2367_s28   ;;  %s1826_s27 = sphi %s1896_s27, %s2366_s27  }
   0x5   : > { %s1921_s11 = sadd.s32 1, %s1838_s30   ;;  %s202_s12 = sadd.s32 1, %s1834_s29 }
   0x6   : > { %s199_s13 = ssub.s32 %s1838_s30, %s1921_s11  ;;  %p212_p0 = scmp.ne.s32.totalorder %s1834_s29, %s1830_s28 }
   0x7   : > { %p200_p1 = scmp.eq.s32.totalorder %s199_s13, 0  ;;  %p213_p2 = scmp.eq.s32.totalorder %s1917_s9, 1 }
   0x8   : > { %p218_p3 = scmp.ne.s32.totalorder %s1830_s28, %s1826_s27  ;;  %p219_p4 = scmp.eq.s32.totalorder %s1442_s10, 1 }
   0x9   : > { %s1932_s14 = scalar_select %p200_p1, %s1834_s29, %s202_s12  }
   0xa   : > { %p1934_p5 = por %p213_p2, %p212_p0  ;;  %p1938_p6 = por %p219_p4, %p218_p3 }
   0xb   : > { %p1443_p7 = scmp.ge.s32.totalorder %s1838_s30, 1  ;;  %p226_p8 = scmp.lt.s32.totalorder %s1838_s30, 3 }
   0xc   : > { %s2357_s15 = scalar_select %p1934_p5, 1, 0 }
   0xd   : > { %s2358_s16 = scalar_select %p1938_p6, 1, 0 }
   0xe   : > { %p2354_p9 = scmp.eq.s32.totalorder %s1917_s9, 0  ;;  %p1945_p10 = pnand %p1443_p7, %p226_p8 }
   0xf   : > { %s1840_s18 = smov [#allocation3]   ;;  %s1744_s23 = scalar_lea.hbm %s2346_s1, 4096 }
  0x10   : > { %s2359_s17 = scalar_select %p1945_p10, 1, 0 }
  0x11   : > { %s238_s19 = sshll.u32 %s1840_s18, 4  ;;  %p1615_p11 = pneg %p1945_p10  ;;  %s239_s19 = int_to_ptr.vmem [resolvable:$true] %s238_s19 }
  0x12   : > { %p1745_p13 = scmp.ne.s32.totalorder %s2346_s1, %s1744_s23  ;;  %p1751_p3 = scmp.lt.u32.totalorder %s1744_s23, %s2346_s1 }
  0x13   : > { %p1953_p12 = pnand %p2354_p9, %p1615_p11 }
  0x15   : > { %p1746_p0 = pneg %p1953_p12 }
  0x17   : > { %p1747_p1 = pnand %p1746_p0, %p1745_p13 }
  0x19   : > { %p1748_p2 = pneg %p1747_p1 }
  0x1b   : > { %p1753_p4 = pnand %p1751_p3, %p1748_p2 }
  0x1d   : > { %1756 = shalt.err (!%p1753_p4)
}
  0x1e   : > { %s1757_s12 = scalar_lea.vmem %s239_s19, 4096  ;;  %p1765_p9 = scmp.lt.s32.totalorder %s239_s19, %s239_s19 }
  0x1f   : > { %p1758_p7 = scmp.ne.s32.totalorder %s239_s19, %s1757_s12  ;;  %p1766_p6 = scmp.lt.s32.totalorder %s1757_s12, %s1757_s12 }
  0x21   : > { %p1760_p8 = pnand %p1758_p7, %p1746_p0  ;;  %p1767_p5 = por %p1766_p6, %p1765_p9 }
  0x23   : > { %p1761_p11 = pneg %p1760_p8 }
  0x25   : > { %p1768_p10 = pnand %p1767_p5, %p1761_p11 }
  0x27   : > { %1771 = shalt.err (!%p1768_p10)
}
  0x28   : > { %s1841_s13 = smov 256   ;;  %s1842_s18 = smov 16  }
  0x29   : > { %1618 = dma.hbm_to_vmem [thread:$0]  (!%p1953_p12), %s2346_s1, 4096, %s239_s19, [#allocation4], %s1841_s13, %s1841_s13, %s1842_s18  }
  0x2a   : > { %p2361_p13 = scmp.ne.s32.totalorder %s2359_s17, 0 }
  0x2b   : > { %p2362_p1 = scmp.eq.s32.totalorder (!%p2361_p13), %s1917_s9, 0 }
  0x2c   : > { %281 = sbr.rel (%p2361_p13) target bundleno = 1790 (0x6fe), region = 52 }
  0x33   : > { %1817 = dma.done.wait (%p2362_p1), [#allocation4], 4096   ;;  %p2363_p0 = pmov %p2362_p1 }
  0x34   : > { %s1449_s23 = sshll.u32 %s1917_s9, 1  ;;  %vm323_vm0 = vcmask 326656   ;;  %v1843_v0 = vmov 0.0   ;;  %vm1844_vm1 = vmmov 0   ;;  %v1845_v1 = vmov 0   ;;  %v1668_v2 = vld [vmem:[%s2347_s2] sm:$0xff]  }
  0x35   : > { %1819 = vsyncadd (%p2363_p0), [#allocation4], 4294963200  ;;  %1537 = vmatprep.subr.bf16.mxu1 %v1843_v0  ;;  %1539 = vmatprep.mubr.msk.bf16.mxu1 %vm1844_vm1, %v1843_v0  ;;  %p316_p5 = scmp.lt.s32.totalorder %s1449_s23, 3  ;;  %324 = vst.msk [vmem:[#allocation2] sm:$0xff] %vm323_vm0, %v1845_v1  ;;  %vm328_vm2 = vcmask 130048   ;;  %s312_s22 = sand.u32 1, %s1830_s28  }
  0x36   : > { %712 = vmatprep.mubr.bf16.mxu0 %v1845_v1  ;;  %1538 = vmatpush3.bf16.msra.mxu1 %v1668_v2  ;;  %v1993_v7 = vld [vmem:[#allocation3 + $0x4] ss:$16 sps:$4 sm:$0xff]   ;;  %v1995_v8 = vld [vmem:[#allocation3 + $0xc] ss:$16 sps:$4 sm:$0xff]   ;;  %v1997_v9 = vld [vmem:[#allocation3] ss:$16 sps:$4 sm:$0xff]  }
  0x37   : > { %s2371_s23 = smov (!%p316_p5, %s1449_s23), 3  ;;  %v1999_v10 = vld [vmem:[#allocation3 + $0x8] ss:$16 sps:$4 sm:$0xff]   ;;  %637 = vmatprep.subr.bf16.mxu1 %v1993_v7  ;;  %680 = vmatprep.subr.bf16.mxu0 %v1995_v8  ;;  %v2005_v11 = vld [vmem:[#allocation3 + $0x24] ss:$16 sps:$4 sm:$0xff]   ;;  %vm330_vm11 = vcmask 1047936  }
  0x38   : > { %s1450_s17 = sshll.u32 %s2371_s23, 3  ;;  %681 = vmatpush1.bf16.msra.mxu0 %v1999_v10  ;;  %v2007_v12 = vld [vmem:[#allocation3 + $0x2c] ss:$16 sps:$4 sm:$0xff]   ;;  %v2009_v13 = vld [vmem:[#allocation3 + $0x20] ss:$16 sps:$4 sm:$0xff]   ;;  %s1448_s23 = sshll.u32 %s312_s22, 4 }
  0x39   : > { %s319_s24 = scalar_lea.vmem %s2345_s0, %s1450_s17  ;;  %v2011_v14 = vld [vmem:[#allocation3 + $0x28] ss:$16 sps:$4 sm:$0xff]   ;;  %682 = vmatprep.subr.bf16.mxu0 %v2007_v12  ;;  %v2017_v15 = vld [vmem:[#allocation3 + $0x44] ss:$16 sps:$4 sm:$0xff]   ;;  %v2019_v16 = vld [vmem:[#allocation3 + $0x4c] ss:$16 sps:$4 sm:$0xff]  }
  0x3a   : > { %v325_v3 = vld [vmem:[%s319_s24] sm:$0xff]  ;;  %v326_v4 = vld [vmem:[%s319_s24 + $0x8] sm:$0xff]  ;;  %s2167_s17 = scalar_lea.vmem [#allocation6], %s1448_s23  ;;  %vm955_vm12 = vcmask 1043456   ;;  %vm921_vm13 = vcmask 195584   ;;  %s1846_s12 = smov 16  }
  0x3b   : > { %v327_v5 = vpack.c.bf16 %v326_v4, %v325_v3  ;;  %v2021_v17 = vld [vmem:[#allocation3 + $0x40] ss:$16 sps:$4 sm:$0xff]   ;;  %v2023_v18 = vld [vmem:[#allocation3 + $0x48] ss:$16 sps:$4 sm:$0xff]   ;;  %v2029_v19 = vld [vmem:[#allocation3 + $0x64] ss:$16 sps:$4 sm:$0xff]  }
  0x3c   : > { %683 = vmatpush1.bf16.msra.mxu0 %v2011_v14  ;;  %v2031_v20 = vld [vmem:[#allocation3 + $0x6c] ss:$16 sps:$4 sm:$0xff]   ;;  %v2033_v21 = vld [vmem:[#allocation3 + $0x60] ss:$16 sps:$4 sm:$0xff]   ;;  %v2035_v22 = vld [vmem:[#allocation3 + $0x68] ss:$16 sps:$4 sm:$0xff]  }
  0x3d   : > { %329 = vst.msk [vmem:[#allocation2] sm:$0xff] %vm328_vm2, %v327_v5  ;;  %684 = vmatprep.subr.bf16.mxu0 %v2019_v16  ;;  %v2041_v23 = vld [vmem:[#allocation3 + $0x84] ss:$16 sps:$4 sm:$0xff]   ;;  %v2043_v24 = vld [vmem:[#allocation3 + $0x8c] ss:$16 sps:$4 sm:$0xff]   ;;  %vm929_vm14 = vcmask 326784  }
  0x3e   : > { %v2045_v25 = vld [vmem:[#allocation3 + $0x80] ss:$16 sps:$4 sm:$0xff]   ;;  %v2047_v26 = vld [vmem:[#allocation3 + $0x88] ss:$16 sps:$4 sm:$0xff]   ;;  %v2053_v27 = vld [vmem:[#allocation3 + $0xa4] ss:$16 sps:$4 sm:$0xff]  }
  0x3f   : > { %v2055_v28 = vld [vmem:[#allocation3 + $0xac] ss:$16 sps:$4 sm:$0xff]   ;;  %v2057_v29 = vld [vmem:[#allocation3 + $0xa0] ss:$16 sps:$4 sm:$0xff]   ;;  %v2059_v30 = vld [vmem:[#allocation3 + $0xa8] ss:$16 sps:$4 sm:$0xff]  }
  0x40   : > { %685 = vmatpush1.bf16.msra.mxu0 %v2023_v18  ;;  %v2065_v31 = vld [vmem:[#allocation3 + $0xc4] ss:$16 sps:$4 sm:$0xff]   ;;  %v2067_v32 = vld [vmem:[#allocation3 + $0xcc] ss:$16 sps:$4 sm:$0xff]   ;;  %v2069_v33 = vld [vmem:[#allocation3 + $0xc0] ss:$16 sps:$4 sm:$0xff]  }
  0x41   : > { %686 = vmatprep.subr.bf16.mxu0 %v2031_v20  ;;  %v2071_v34 = vld [vmem:[#allocation3 + $0xc8] ss:$16 sps:$4 sm:$0xff]   ;;  %v2077_v35 = vld [vmem:[#allocation3 + $0xe4] ss:$16 sps:$4 sm:$0xff]   ;;  %v2079_v36 = vld [vmem:[#allocation3 + $0xec] ss:$16 sps:$4 sm:$0xff]  }
  0x42   : > { %v2081_v37 = vld [vmem:[#allocation3 + $0xe0] ss:$16 sps:$4 sm:$0xff]   ;;  %v2083_v38 = vld [vmem:[#allocation3 + $0xe8] ss:$16 sps:$4 sm:$0xff]   ;;  %331 = vst.msk [vmem:[%s2167_s17] sm:$0xff] %vm330_vm11, %v1843_v0  ;;  %332 = vst.msk [vmem:[%s2167_s17 + $0x8] sm:$0xff] %vm330_vm11, %v1843_v0 }
  0x43   : > { %v1453_v39 = vld [vmem:[%s2348_s3] ss:$0 sm:$0xff]  ;;  %s1847_s25 = smov 24   ;;  %s1512_s26 = sshll.u32 %s1917_s9, 8 }
  0x44   : > { %v365_v6 = vld [vmem:[#allocation2] sm:$0xff]  ;;  %687 = vmatpush1.bf16.msra.mxu0 %v2035_v22  ;;  %s1368_s10 = sshll.u32 %s2167_s17, 4  ;;  %s2296_s18 = scalar_lea.hbm %s2353_s8, %s1512_s26  ;;  %s2298_s10 = int_to_ptr.vmem [resolvable:$true] %s1368_s10 }
  0x45   : > { %1540 = vmatmul.mubr.msk.bf16.vlgmr.msra.gmra.mrb[0].mxu1 %vm328_vm2, %v365_v6  ;;  %688 = vmatprep.subr.bf16.mxu0 %v2043_v24  ;;  %s2304_s21 = scalar_lea.sflag [#allocation5], %s312_s22  ;;  %s1772_s9 = scalar_lea.vmem %s2298_s10, 256 }
  0x46   : > { %669 = vmatprep.mubr.bf16.mxu1 %v1845_v1  ;;  %638 = vmatpush1.bf16.msra.mxu1 %v1997_v9  ;;  %p1773_p6 = scmp.ne.s32.totalorder %s2298_s10, %s1772_s9  ;;  %p2364_p9 = scmp.ne.s32.totalorder %s2357_s15, 0 }
  0x47   : > { %639 = vmatprep.subr.bf16.mxu1 %v2005_v11  ;;  %s1848_s23 = smov [#allocation6]  }
  0x48   : > { %689 = vmatpush1.bf16.msra.mxu0 %v2047_v26  ;;  %p1774_p10 = pnand %p1773_p6, %p2364_p9  ;;  %s1776_s19 = sshll.u32 %s1848_s23, 4  ;;  %s1777_s19 = int_to_ptr.vmem [resolvable:$false] %s1776_s19 }
  0x49   : > { %690 = vmatprep.subr.bf16.mxu0 %v2055_v28  ;;  %s1778_s20 = scalar_lea.vmem %s1777_s19, 512  ;;  %p1779_p2 = scmp.lt.s32.totalorder %s2298_s10, %s1777_s19 }
  0x4a   : > { %640 = vmatpush1.bf16.msra.mxu1 %v2009_v13  ;;  %p1775_p12 = pneg %p1774_p10  ;;  %p1780_p3 = scmp.lt.s32.totalorder %s1778_s20, %s1772_s9 }
  0x4b   : > { %641 = vmatprep.subr.bf16.mxu1 %v2017_v15 }
  0x4c   : > { %691 = vmatpush1.bf16.msra.mxu0 %v2059_v30  ;;  %p1781_p4 = por %p1780_p3, %p1779_p2 }
  0x4d   : > { %692 = vmatprep.subr.bf16.mxu0 %v2067_v32 }
  0x4e   : > { %642 = vmatpush1.bf16.msra.mxu1 %v2021_v17  ;;  %p1782_p7 = pnand %p1781_p4, %p1775_p12 }
  0x4f   : > { %643 = vmatprep.subr.bf16.mxu1 %v2029_v19 }
  0x50   : > { %693 = vmatpush1.bf16.msra.mxu0 %v2071_v34 }
  0x51   : > { %694 = vmatprep.subr.bf16.mxu0 %v2079_v36 }
  0x52   : > { %644 = vmatpush1.bf16.msra.mxu1 %v2033_v21 }
  0x53   : > { %645 = vmatprep.subr.bf16.mxu1 %v2041_v23 }
  0x54   : > { %695 = vmatpush1.bf16.msra.mxu0 %v2083_v38 }
  0x55   : > { %766 = vmatprep.subr.bf16.mxu0 %v1995_v8 }
  0x56   : > { %646 = vmatpush1.bf16.msra.mxu1 %v2045_v25 }
  0x57   : > { %647 = vmatprep.subr.bf16.mxu1 %v2053_v27 }
  0x5a   : > { %648 = vmatpush1.bf16.msra.mxu1 %v2057_v29 }
  0x5b   : > { %649 = vmatprep.subr.bf16.mxu1 %v2065_v31 }
  0x5e   : > { %650 = vmatpush1.bf16.msra.mxu1 %v2069_v33 }
  0x5f   : > { %651 = vmatprep.subr.bf16.mxu1 %v2077_v35 }
  0x62   : > { %652 = vmatpush1.bf16.msra.mxu1 %v2081_v37 }
  0x63   : > { %723 = vmatprep.subr.bf16.mxu1 %v1993_v7 }
 0x118   : > { %v411_v40 = vpop.f32.mrb[0].mxu1 }
 0x119   : > { %v425_v41 = vsub.f32 %v411_v40, %v1453_v39  ;;  %v1541_v42 = vpop.f32.mrb[1].mxu1 }
 0x11a   : > { %v414_v43 = vpop.f32.mrb[2].mxu1 }
 0x11b   : > { %v427_v44 = vand.u32 2147483647, %v425_v41  ;;  %v426_v45 = vsub.f32 %v414_v43, %v1453_v39  ;;  %v1542_v46 = vpop.f32.mrb[3].mxu1  ;;  %vm429_vm9 = vcmp.ge.f32.partialorder %v425_v41, 0.0  ;;  %v1717_v41 = vld [vmem:[%s2349_s4] sm:$0xff]  }
 0x11d   : > { %v431_v47 = vmul.f32 %v427_v44, %v427_v44  ;;  %v428_v48 = vand.u32 2147483647, %v426_v45  ;;  %vm430_vm10 = vcmp.ge.f32.partialorder %v426_v45, 0.0  ;;  %v1718_v45 = vld [vmem:[%s2349_s4 + $0x8] sm:$0xff]  }
 0x11f   : > { %v433_v49 = vsub.f32 8.0, %v431_v47  ;;  %v432_v50 = vmul.f32 %v428_v48, %v428_v48 }
 0x121   : > { %v435_v51 = vmax.f32 %v433_v49, 0.0  ;;  %v434_v52 = vsub.f32 8.0, %v432_v50 }
 0x123   : > { %1736 = vrsqrt.f32 %v435_v51  ;;  %v436_v53 = vmax.f32 %v434_v52, 0.0  ;;  %vm439_vm3 = vcmp.eq.f32.partialorder %v435_v51, inf  ;;  %v442_v56 = vand.u32 2147483648, %v435_v51 }
 0x124   : > { %vm441_vm4 = vcmp.eq.f32.partialorder %v435_v51, 0.0 }
 0x125   : > { %1738 = vrsqrt.f32 %v436_v53  ;;  %vm446_vm5 = vcmp.eq.f32.partialorder %v436_v53, inf  ;;  %v449_v62 = vand.u32 2147483648, %v436_v53  ;;  %vm448_vm6 = vcmp.eq.f32.partialorder %v436_v53, 0.0 }
 0x12d   : > { %v1737_v54 = vpop.eup %1736 }
 0x12e   : > { %v438_v55 = vmul.f32 %v1737_v54, %v435_v51 }
 0x12f   : > { %v1739_v57 = vpop.eup %1738 }
 0x130   : > { %v440_v58 = vsel %vm439_vm3, %v435_v51, %v438_v55  ;;  %v445_v60 = vmul.f32 %v1739_v57, %v436_v53 }
 0x131   : > { %v443_v59 = vsel %vm441_vm4, %v442_v56, %v440_v58 }
 0x132   : > { %v451_v61 = vadd.f32 %v443_v59, %v427_v44  ;;  %v447_v63 = vsel %vm446_vm5, %v436_v53, %v445_v60 }
 0x133   : > { %v450_v3 = vsel %vm448_vm6, %v449_v62, %v447_v63  ;;  %v1721_v62 = vld [vmem:[%s2349_s4 + $0x20] sm:$0xff]   ;;  %v1722_v63 = vld [vmem:[%s2349_s4 + $0x28] sm:$0xff]  }
 0x134   : > { %v453_v2 = vmul.f32 0.5, %v451_v61  ;;  %v452_v4 = vadd.f32 %v450_v3, %v428_v48  ;;  %v1720_v61 = vld [vmem:[%s2349_s4 + $0x18] sm:$0xff]  }
 0x135   : > { %v1724_v3 = vld [vmem:[%s2349_s4 + $0x38] sm:$0xff]  }
 0x136   : > { %vm455_vm7 = vcmp.le.f32.partialorder %v453_v2, %v427_v44  ;;  %v454_v6 = vmul.f32 0.5, %v452_v4 }
 0x137   : > { %v457_v5 = vsel %vm455_vm7, 2.0, %v453_v2  ;;  %v1723_v2 = vld [vmem:[%s2349_s4 + $0x30] sm:$0xff]  }
 0x138   : > { %v459_v39 = vsub.f32 %v457_v5, %v427_v44  ;;  %vm456_vm8 = vcmp.le.f32.partialorder %v454_v6, %v428_v48 }
 0x139   : > { %v458_v42 = vsel %vm456_vm8, 2.0, %v454_v6 }
 0x13a   : > { %v461_v40 = vmax.f32 %v459_v39, 0.0  ;;  %v460_v43 = vsub.f32 %v458_v42, %v428_v48  ;;  %v1719_v48 = vld [vmem:[%s2349_s4 + $0x10] sm:$0xff]  }
 0x13c   : > { %v463_v46 = vmul.f32 %v461_v40, %v461_v40  ;;  %v462_v47 = vmax.f32 %v460_v43, 0.0 }
 0x13e   : > { %v465_v49 = vmul.f32 0.25, %v463_v46  ;;  %v464_v50 = vmul.f32 %v462_v47, %v462_v47 }
 0x140   : > { %v467_v51 = vsub.f32 1.0, %v465_v49  ;;  %v466_v52 = vmul.f32 0.25, %v464_v50 }
 0x142   : > { %v468_v54 = vsub.f32 1.0, %v466_v52  ;;  %v469_v53 = vsel %vm429_vm9, %v467_v51, %v465_v49 }
 0x144   : > { %v470_v55 = vsel %vm430_vm10, %v468_v54, %v466_v52 }
 0x145   : > { %v471_v56 = vpack.c.bf16 %v470_v55, %v469_v53 }
 0x147   : > { %v473_v57 = vunpack.c.h.bf16 %v471_v56  ;;  %v472_v58 = vunpack.c.l.bf16 %v471_v56 }
 0x149   : > { %v475_v59 = vsub.f32 %v470_v55, %v473_v57  ;;  %v474_v44 = vsub.f32 %v469_v53, %v472_v58  ;;  %v1725_v55 = vld [vmem:[%s2350_s5] sm:$0xff]   ;;  %v1727_v57 = vld [vmem:[%s2350_s5 + $0x10] ss:$0 sps:$4 sm:$0xff]  }
 0x14b   : > { %v476_v60 = vpack.c.bf16 %v475_v59, %v474_v44 }
 0x14d   : > { %670 = vmatmul.mubr.bf16.vlgmr.msra.gmra.mrb[4].mxu1 %v476_v60  ;;  %713 = vmatmul.mubr.bf16.vlgmr.msra.gmra.mrb[0].mxu0 %v476_v60 }
 0x14e   : > { %724 = vmatpush1.bf16.msra.mxu1 %v1997_v9  ;;  %767 = vmatpush1.bf16.msra.mxu0 %v1999_v10 }
 0x14f   : > { %725 = vmatprep.subr.bf16.mxu1 %v2005_v11  ;;  %768 = vmatprep.subr.bf16.mxu0 %v2007_v12 }
 0x150   : > { %755 = vmatprep.mubr.bf16.mxu1 %v1845_v1  ;;  %798 = vmatprep.mubr.bf16.mxu0 %v1845_v1 }
 0x152   : > { %726 = vmatpush1.bf16.msra.mxu1 %v2009_v13  ;;  %769 = vmatpush1.bf16.msra.mxu0 %v2011_v14 }
 0x153   : > { %727 = vmatprep.subr.bf16.mxu1 %v2017_v15  ;;  %770 = vmatprep.subr.bf16.mxu0 %v2019_v16 }
 0x156   : > { %728 = vmatpush1.bf16.msra.mxu1 %v2021_v17  ;;  %771 = vmatpush1.bf16.msra.mxu0 %v2023_v18 }
 0x157   : > { %729 = vmatprep.subr.bf16.mxu1 %v2029_v19  ;;  %772 = vmatprep.subr.bf16.mxu0 %v2031_v20 }
 0x15a   : > { %730 = vmatpush1.bf16.msra.mxu1 %v2033_v21  ;;  %773 = vmatpush1.bf16.msra.mxu0 %v2035_v22 }
 0x15b   : > { %731 = vmatprep.subr.bf16.mxu1 %v2041_v23  ;;  %774 = vmatprep.subr.bf16.mxu0 %v2043_v24 }
 0x15e   : > { %732 = vmatpush1.bf16.msra.mxu1 %v2045_v25  ;;  %775 = vmatpush1.bf16.msra.mxu0 %v2047_v26 }
 0x15f   : > { %733 = vmatprep.subr.bf16.mxu1 %v2053_v27  ;;  %776 = vmatprep.subr.bf16.mxu0 %v2055_v28 }
 0x162   : > { %734 = vmatpush1.bf16.msra.mxu1 %v2057_v29  ;;  %777 = vmatpush1.bf16.msra.mxu0 %v2059_v30 }
 0x163   : > { %735 = vmatprep.subr.bf16.mxu1 %v2065_v31  ;;  %778 = vmatprep.subr.bf16.mxu0 %v2067_v32 }
 0x166   : > { %736 = vmatpush1.bf16.msra.mxu1 %v2069_v33  ;;  %779 = vmatpush1.bf16.msra.mxu0 %v2071_v34 }
 0x167   : > { %737 = vmatprep.subr.bf16.mxu1 %v2077_v35  ;;  %780 = vmatprep.subr.bf16.mxu0 %v2079_v36 }
 0x16a   : > { %738 = vmatpush1.bf16.msra.mxu1 %v2081_v37  ;;  %781 = vmatpush1.bf16.msra.mxu0 %v2083_v38 }
 0x16b   : > { %1543 = vmatprep.subr.bf16.mxu1 %v1843_v0  ;;  %1563 = vmatprep.subr.bf16.mxu0 %v1843_v0 }
 0x16d   : > { %756 = vmatmul.mubr.bf16.vlgmr.msra.gmra.mrb[4].mxu1 %v471_v56  ;;  %799 = vmatmul.mubr.bf16.vlgmr.msra.gmra.mrb[0].mxu0 %v471_v56  ;;  %v1726_v56 = vld [vmem:[%s2350_s5 + $0x8] sm:$0xff]  }
 0x16e   : > { %1544 = vmatpush3.bf16.msra.mxu1 %v1717_v41  ;;  %1559 = vmatprep.mubr.msk.bf16.mxu1 %vm1844_vm1, %v1843_v0 }
 0x16f   : > { %1545 = vmatprep.subr.bf16.mxu1 %v1843_v0  ;;  %1569 = vmatprep.mubr.msk.bf16.mxu0 %vm1844_vm1, %v1843_v0 }
 0x170   : > { %1564 = vmatpush3.bf16.msra.mxu0 %v1725_v55 }
 0x171   : > { %1565 = vmatprep.subr.bf16.mxu0 %v1843_v0 }
 0x172   : > { %1546 = vmatpush3.bf16.msra.mxu1 %v1718_v45 }
 0x173   : > { %1547 = vmatprep.subr.bf16.mxu1 %v1843_v0 }
 0x174   : > { %1566 = vmatpush3.bf16.msra.mxu0 %v1726_v56 }
 0x175   : > { %1567 = vmatprep.subr.bf16.mxu0 %v1843_v0 }
 0x176   : > { %1548 = vmatpush3.bf16.msra.mxu1 %v1719_v48 }
 0x177   : > { %1549 = vmatprep.subr.bf16.mxu1 %v1843_v0 }
 0x17a   : > { %1550 = vmatpush3.bf16.msra.mxu1 %v1720_v61  ;;  %v1498_v61 = vld [vmem:[%s2351_s6] ss:$0 sm:$0xff] }
 0x17b   : > { %1551 = vmatprep.subr.bf16.mxu1 %v1843_v0 }
 0x17e   : > { %1552 = vmatpush3.bf16.msra.mxu1 %v1721_v62 }
 0x17f   : > { %1553 = vmatprep.subr.bf16.mxu1 %v1843_v0 }
 0x182   : > { %1554 = vmatpush3.bf16.msra.mxu1 %v1722_v63 }
 0x183   : > { %1555 = vmatprep.subr.bf16.mxu1 %v1843_v0 }
 0x186   : > { %1556 = vmatpush3.bf16.msra.mxu1 %v1723_v2 }
 0x187   : > { %1557 = vmatprep.subr.bf16.mxu1 %v1843_v0 }
 0x18a   : > { %1558 = vmatpush3.bf16.msra.mxu1 %v1724_v3 }
 0x18b   : > { %1102 = vmatprep.subr.bf16.mxu1 %v1995_v8 }
 0x240   : > { %v757_v4 = vpop.f32.mrb[4].mxu1  ;;  %v800_v5 = vpop.f32.mrb[0].mxu0 }
 0x241   : > { %v759_v6 = vpop.f32.mrb[5].mxu1  ;;  %v802_v39 = vpop.f32.mrb[1].mxu0 }
 0x242   : > { %v809_v40 = vmul.f32 %v759_v6, %v757_v4  ;;  %v761_v42 = vpop.f32.mrb[6].mxu1  ;;  %v804_v43 = vpop.f32.mrb[2].mxu0 }
 0x243   : > { %v763_v46 = vpop.f32.mrb[7].mxu1  ;;  %v806_v47 = vpop.f32.mrb[3].mxu0 }
 0x244   : > { %v811_v49 = vmul.f32 %v809_v40, %v800_v5  ;;  %v810_v50 = vmul.f32 %v763_v46, %v761_v42 }
 0x246   : > { %v813_v51 = vmul.f32 %v811_v49, %v802_v39  ;;  %v812_v52 = vmul.f32 %v810_v50, %v804_v43 }
 0x248   : > { %v814_v54 = vmul.f32 %v812_v52, %v806_v47 }
 0x24a   : > { %v815_v53 = vpack.c.bf16 %v814_v54, %v813_v51 }
 0x24c   : > { %1560 = vmatmul.mubr.bf16.vlgmr.msra.gmra.mrb[8].mxu1 %v815_v53 }
 0x24d   : > { %1103 = vmatpush1.bf16.msra.mxu1 %v1999_v10  ;;  %1134 = vmatprep.mubr.bf16.mxu1 %v1845_v1 }
 0x24e   : > { %1104 = vmatprep.subr.bf16.mxu1 %v2007_v12 }
 0x251   : > { %1105 = vmatpush1.bf16.msra.mxu1 %v2011_v14 }
 0x252   : > { %1106 = vmatprep.subr.bf16.mxu1 %v2019_v16 }
 0x255   : > { %1107 = vmatpush1.bf16.msra.mxu1 %v2023_v18 }
 0x256   : > { %1108 = vmatprep.subr.bf16.mxu1 %v2031_v20 }
 0x259   : > { %1109 = vmatpush1.bf16.msra.mxu1 %v2035_v22 }
 0x25a   : > { %1110 = vmatprep.subr.bf16.mxu1 %v2043_v24 }
 0x25d   : > { %1111 = vmatpush1.bf16.msra.mxu1 %v2047_v26 }
 0x25e   : > { %1112 = vmatprep.subr.bf16.mxu1 %v2055_v28 }
 0x261   : > { %1113 = vmatpush1.bf16.msra.mxu1 %v2059_v30 }
 0x262   : > { %1114 = vmatprep.subr.bf16.mxu1 %v2067_v32 }
 0x265   : > { %1115 = vmatpush1.bf16.msra.mxu1 %v2071_v34 }
 0x266   : > { %1116 = vmatprep.subr.bf16.mxu1 %v2079_v36 }
 0x269   : > { %1117 = vmatpush1.bf16.msra.mxu1 %v2083_v38 }
 0x26a   : > { %1188 = vmatprep.subr.bf16.mxu1 %v1995_v8  ;;  %v957_v8 = vsel %vm955_vm12, %v1727_v57, 0 }
 0x26b   : > { %1568 = vmatpush3.bf16.msra.mxu0 %v957_v8 }
 0x26c   : > { %1059 = vmatprep.subr.bf16.mxu0 %v1993_v7 }
 0x31f   : > { %v914_v58 = vpop.f32.mrb[8].mxu1 }
 0x320   : > { %922 = vst.msk [vmem:[%s2167_s17] sm:$0xff] %vm921_vm13, %v914_v58  ;;  %v1561_v59 = vpop.f32.mrb[9].mxu1 }
 0x321   : > { %v917_v44 = vpop.f32.mrb[10].mxu1 }
 0x322   : > { %923 = vst.msk [vmem:[%s2167_s17 + $0x8] sm:$0xff] %vm921_vm13, %v917_v44  ;;  %v1562_v60 = vpop.f32.mrb[11].mxu1  ;;  %v924_v41 = vpack.c.bf16 %v917_v44, %v914_v58 }
 0x324   : > { %926 = vrot.lane.b32.xlu0 %v924_v41, %s1846_s12 }
 0x396   : > { %v927_v45 = vpop.permute.xlu0 %926 }
 0x397   : > { %930 = vst.msk [vmem:[#allocation2] sm:$0xff] %vm929_vm14, %v927_v45 }
 0x39e   : > { %v931_v48 = vld [vmem:[#allocation2] sm:$0xff] }
 0x39f   : > { %1570 = vmatmul.mubr.msk.bf16.vlgmr.msra.gmra.mrb[4].mxu0 %vm323_vm0, %v931_v48 }
 0x3a0   : > { %1060 = vmatpush1.bf16.msra.mxu0 %v1997_v9  ;;  %1091 = vmatprep.mubr.bf16.mxu0 %v1845_v1 }
 0x3a1   : > { %1061 = vmatprep.subr.bf16.mxu0 %v2005_v11 }
 0x3a4   : > { %1062 = vmatpush1.bf16.msra.mxu0 %v2009_v13 }
 0x3a5   : > { %1063 = vmatprep.subr.bf16.mxu0 %v2017_v15 }
 0x3a8   : > { %1064 = vmatpush1.bf16.msra.mxu0 %v2021_v17 }
 0x3a9   : > { %1065 = vmatprep.subr.bf16.mxu0 %v2029_v19 }
 0x3ac   : > { %1066 = vmatpush1.bf16.msra.mxu0 %v2033_v21 }
 0x3ad   : > { %1067 = vmatprep.subr.bf16.mxu0 %v2041_v23 }
 0x3b0   : > { %1068 = vmatpush1.bf16.msra.mxu0 %v2045_v25 }
 0x3b1   : > { %1069 = vmatprep.subr.bf16.mxu0 %v2053_v27 }
 0x3b4   : > { %1070 = vmatpush1.bf16.msra.mxu0 %v2057_v29 }
 0x3b5   : > { %1071 = vmatprep.subr.bf16.mxu0 %v2065_v31 }
 0x3b8   : > { %1072 = vmatpush1.bf16.msra.mxu0 %v2069_v33 }
 0x3b9   : > { %1073 = vmatprep.subr.bf16.mxu0 %v2077_v35 }
 0x3bc   : > { %1074 = vmatpush1.bf16.msra.mxu0 %v2081_v37 }
 0x3bd   : > { %1145 = vmatprep.subr.bf16.mxu0 %v1993_v7 }
 0x472   : > { %v993_v62 = vpop.f32.mrb[4].mxu0 }
 0x473   : > { %v1007_v63 = vsub.f32 %v993_v62, %v1498_v61  ;;  %v1571_v2 = vpop.f32.mrb[5].mxu0 }
 0x474   : > { %v996_v3 = vpop.f32.mrb[6].mxu0 }
 0x475   : > { %v1009_v4 = vand.u32 2147483647, %v1007_v63  ;;  %v1008_v5 = vsub.f32 %v996_v3, %v1498_v61  ;;  %v1572_v6 = vpop.f32.mrb[7].mxu0  ;;  %vm1011_vm6 = vcmp.ge.f32.partialorder %v1007_v63, 0.0 }
 0x477   : > { %v1013_v39 = vmul.f32 %v1009_v4, %v1009_v4  ;;  %v1010_v40 = vand.u32 2147483647, %v1008_v5  ;;  %vm1012_vm7 = vcmp.ge.f32.partialorder %v1008_v5, 0.0 }
 0x479   : > { %v1015_v42 = vsub.f32 8.0, %v1013_v39  ;;  %v1014_v43 = vmul.f32 %v1010_v40, %v1010_v40 }
 0x47b   : > { %v1017_v46 = vmax.f32 %v1015_v42, 0.0  ;;  %v1016_v47 = vsub.f32 8.0, %v1014_v43 }
 0x47d   : > { %1740 = vrsqrt.f32 %v1017_v46  ;;  %v1018_v49 = vmax.f32 %v1016_v47, 0.0  ;;  %vm1021_vm15 = vcmp.eq.f32.partialorder %v1017_v46, inf  ;;  %v1024_v51 = vand.u32 2147483648, %v1017_v46 }
 0x47e   : > { %vm1023_vm0 = vcmp.eq.f32.partialorder %v1017_v46, 0.0 }
 0x47f   : > { %1742 = vrsqrt.f32 %v1018_v49  ;;  %vm1028_vm2 = vcmp.eq.f32.partialorder %v1018_v49, inf  ;;  %v1031_v57 = vand.u32 2147483648, %v1018_v49  ;;  %vm1030_vm3 = vcmp.eq.f32.partialorder %v1018_v49, 0.0 }
 0x487   : > { %v1741_v7 = vpop.eup %1740 }
 0x488   : > { %v1020_v50 = vmul.f32 %v1741_v7, %v1017_v46 }
 0x489   : > { %v1743_v52 = vpop.eup %1742 }
 0x48a   : > { %v1022_v54 = vsel %vm1021_vm15, %v1017_v46, %v1020_v50  ;;  %v1027_v55 = vmul.f32 %v1743_v52, %v1018_v49 }
 0x48b   : > { %v1025_v53 = vsel %vm1023_vm0, %v1024_v51, %v1022_v54 }
 0x48c   : > { %v1033_v56 = vadd.f32 %v1025_v53, %v1009_v4  ;;  %v1029_v8 = vsel %vm1028_vm2, %v1018_v49, %v1027_v55 }
 0x48d   : > { %v1032_v59 = vsel %vm1030_vm3, %v1031_v57, %v1029_v8 }
 0x48e   : > { %v1035_v58 = vmul.f32 0.5, %v1033_v56  ;;  %v1034_v44 = vadd.f32 %v1032_v59, %v1010_v40 }
 0x490   : > { %vm1037_vm4 = vcmp.le.f32.partialorder %v1035_v58, %v1009_v4  ;;  %v1036_v41 = vmul.f32 0.5, %v1034_v44 }
 0x491   : > { %v1039_v60 = vsel %vm1037_vm4, 2.0, %v1035_v58 }
 0x492   : > { %v1041_v45 = vsub.f32 %v1039_v60, %v1009_v4  ;;  %vm1038_vm5 = vcmp.le.f32.partialorder %v1036_v41, %v1010_v40 }
 0x493   : > { %v1040_v61 = vsel %vm1038_vm5, 2.0, %v1036_v41 }
 0x494   : > { %v1043_v48 = vmax.f32 %v1041_v45, 0.0  ;;  %v1042_v62 = vsub.f32 %v1040_v61, %v1010_v40 }
 0x496   : > { %v1045_v2 = vmul.f32 %v1043_v48, %v1043_v48  ;;  %v1044_v3 = vmax.f32 %v1042_v62, 0.0 }
 0x498   : > { %v1047_v6 = vmul.f32 0.25, %v1045_v2  ;;  %v1046_v39 = vmul.f32 %v1044_v3, %v1044_v3 }
 0x49a   : > { %v1049_v42 = vsub.f32 1.0, %v1047_v6  ;;  %v1048_v43 = vmul.f32 0.25, %v1046_v39 }
 0x49c   : > { %v1050_v46 = vsub.f32 1.0, %v1048_v43  ;;  %v1051_v47 = vsel %vm1011_vm6, %v1049_v42, %v1047_v6 }
 0x49e   : > { %v1052_v49 = vsel %vm1012_vm7, %v1050_v46, %v1048_v43 }
 0x49f   : > { %v1053_v7 = vpack.c.bf16 %v1052_v49, %v1051_v47 }
 0x4a1   : > { %v1055_v50 = vunpack.c.h.bf16 %v1053_v7  ;;  %v1054_v51 = vunpack.c.l.bf16 %v1053_v7 }
 0x4a3   : > { %v1057_v52 = vsub.f32 %v1052_v49, %v1055_v50  ;;  %v1056_v4 = vsub.f32 %v1051_v47, %v1054_v51 }
 0x4a5   : > { %v1058_v54 = vpack.c.bf16 %v1057_v52, %v1056_v4 }
 0x4a7   : > { %1092 = vmatmul.mubr.bf16.vlgmr.msra.gmra.mrb[8].mxu0 %v1058_v54  ;;  %1135 = vmatmul.mubr.bf16.vlgmr.msra.gmra.mrb[12].mxu1 %v1058_v54 }
 0x4a8   : > { %1146 = vmatpush1.bf16.msra.mxu0 %v1997_v9  ;;  %1189 = vmatpush1.bf16.msra.mxu1 %v1999_v10  ;;  %v1729_v9 = vld [vmem:[%s2352_s7 + $0x8] sm:$0xff]   ;;  %v1730_v10 = vld [vmem:[%s2352_s7 + $0x10] sm:$0xff]  }
 0x4a9   : > { %1147 = vmatprep.subr.bf16.mxu0 %v2005_v11  ;;  %1190 = vmatprep.subr.bf16.mxu1 %v2007_v12  ;;  %v1731_v11 = vld [vmem:[%s2352_s7 + $0x18] sm:$0xff]   ;;  %v1732_v12 = vld [vmem:[%s2352_s7 + $0x20] sm:$0xff]  }
 0x4aa   : > { %1177 = vmatprep.mubr.bf16.mxu0 %v1845_v1  ;;  %1220 = vmatprep.mubr.bf16.mxu1 %v1845_v1  ;;  %v1728_v1 = vld [vmem:[%s2352_s7] sm:$0xff]  }
 0x4ac   : > { %1148 = vmatpush1.bf16.msra.mxu0 %v2009_v13  ;;  %1191 = vmatpush1.bf16.msra.mxu1 %v2011_v14  ;;  %v1733_v13 = vld [vmem:[%s2352_s7 + $0x28] sm:$0xff]   ;;  %v1734_v14 = vld [vmem:[%s2352_s7 + $0x30] sm:$0xff]  }
 0x4ad   : > { %1149 = vmatprep.subr.bf16.mxu0 %v2017_v15  ;;  %1192 = vmatprep.subr.bf16.mxu1 %v2019_v16  ;;  %v1735_v15 = vld [vmem:[%s2352_s7 + $0x38] sm:$0xff]  }
 0x4b0   : > { %1150 = vmatpush1.bf16.msra.mxu0 %v2021_v17  ;;  %1193 = vmatpush1.bf16.msra.mxu1 %v2023_v18 }
 0x4b1   : > { %1151 = vmatprep.subr.bf16.mxu0 %v2029_v19  ;;  %1194 = vmatprep.subr.bf16.mxu1 %v2031_v20 }
 0x4b4   : > { %1152 = vmatpush1.bf16.msra.mxu0 %v2033_v21  ;;  %1195 = vmatpush1.bf16.msra.mxu1 %v2035_v22 }
 0x4b5   : > { %1153 = vmatprep.subr.bf16.mxu0 %v2041_v23  ;;  %1196 = vmatprep.subr.bf16.mxu1 %v2043_v24 }
 0x4b8   : > { %1154 = vmatpush1.bf16.msra.mxu0 %v2045_v25  ;;  %1197 = vmatpush1.bf16.msra.mxu1 %v2047_v26 }
 0x4b9   : > { %1155 = vmatprep.subr.bf16.mxu0 %v2053_v27  ;;  %1198 = vmatprep.subr.bf16.mxu1 %v2055_v28 }
 0x4bc   : > { %1156 = vmatpush1.bf16.msra.mxu0 %v2057_v29  ;;  %1199 = vmatpush1.bf16.msra.mxu1 %v2059_v30 }
 0x4bd   : > { %1157 = vmatprep.subr.bf16.mxu0 %v2065_v31  ;;  %1200 = vmatprep.subr.bf16.mxu1 %v2067_v32 }
 0x4c0   : > { %1158 = vmatpush1.bf16.msra.mxu0 %v2069_v33  ;;  %1201 = vmatpush1.bf16.msra.mxu1 %v2071_v34 }
 0x4c1   : > { %1159 = vmatprep.subr.bf16.mxu0 %v2077_v35  ;;  %1202 = vmatprep.subr.bf16.mxu1 %v2079_v36 }
 0x4c4   : > { %1160 = vmatpush1.bf16.msra.mxu0 %v2081_v37  ;;  %1203 = vmatpush1.bf16.msra.mxu1 %v2083_v38 }
 0x4c5   : > { %1573 = vmatprep.subr.bf16.mxu0 %v1843_v0 }
 0x4c7   : > { %1178 = vmatmul.mubr.bf16.vlgmr.msra.gmra.mrb[8].mxu0 %v1053_v7  ;;  %1221 = vmatmul.mubr.bf16.vlgmr.msra.gmra.mrb[12].mxu1 %v1053_v7 }
 0x4c8   : > { %1574 = vmatpush3.bf16.msra.mxu0 %v1728_v1  ;;  %1589 = vmatprep.mubr.msk.bf16.mxu0 %vm1844_vm1, %v1843_v0  ;;  %vm1351_vm1 = vcmask 392384  }
 0x4c9   : > { %1575 = vmatprep.subr.bf16.mxu0 %v1843_v0 }
 0x4cc   : > { %1576 = vmatpush3.bf16.msra.mxu0 %v1729_v9 }
 0x4cd   : > { %1577 = vmatprep.subr.bf16.mxu0 %v1843_v0 }
 0x4d0   : > { %1578 = vmatpush3.bf16.msra.mxu0 %v1730_v10 }
 0x4d1   : > { %1579 = vmatprep.subr.bf16.mxu0 %v1843_v0 }
 0x4d4   : > { %1580 = vmatpush3.bf16.msra.mxu0 %v1731_v11 }
 0x4d5   : > { %1581 = vmatprep.subr.bf16.mxu0 %v1843_v0 }
 0x4d8   : > { %1582 = vmatpush3.bf16.msra.mxu0 %v1732_v12 }
 0x4d9   : > { %1583 = vmatprep.subr.bf16.mxu0 %v1843_v0 }
 0x4dc   : > { %1584 = vmatpush3.bf16.msra.mxu0 %v1733_v13 }
 0x4dd   : > { %1585 = vmatprep.subr.bf16.mxu0 %v1843_v0 }
 0x4e0   : > { %1586 = vmatpush3.bf16.msra.mxu0 %v1734_v14 }
 0x4e1   : > { %1587 = vmatprep.subr.bf16.mxu0 %v1843_v0 }
 0x4e4   : > { %1588 = vmatpush3.bf16.msra.mxu0 %v1735_v15 }
 0x59a   : > { %v1179_v16 = vpop.f32.mrb[8].mxu0  ;;  %v1222_v17 = vpop.f32.mrb[12].mxu1 }
 0x59b   : > { %v1181_v18 = vpop.f32.mrb[9].mxu0  ;;  %v1224_v19 = vpop.f32.mrb[13].mxu1 }
 0x59c   : > { %v1231_v20 = vmul.f32 %v1181_v18, %v1179_v16  ;;  %v1183_v21 = vpop.f32.mrb[10].mxu0  ;;  %v1226_v22 = vpop.f32.mrb[14].mxu1 }
 0x59d   : > { %v1185_v23 = vpop.f32.mrb[11].mxu0  ;;  %v1228_v24 = vpop.f32.mrb[15].mxu1 }
 0x59e   : > { %v1233_v25 = vmul.f32 %v1231_v20, %v1222_v17  ;;  %v1232_v26 = vmul.f32 %v1185_v23, %v1183_v21 }
 0x5a0   : > { %v1235_v27 = vmul.f32 %v1233_v25, %v1224_v19  ;;  %v1234_v0 = vmul.f32 %v1232_v26, %v1226_v22 }
 0x5a2   : > { %v1236_v28 = vmul.f32 %v1234_v0, %v1228_v24 }
 0x5a4   : > { %v1237_v29 = vpack.c.bf16 %v1236_v28, %v1235_v27 }
 0x5a6   : > { %1590 = vmatmul.mubr.bf16.vlgmr.msra.gmra.mrb[12].mxu0 %v1237_v29 }
 0x679   : > { %v1336_v30 = vpop.f32.mrb[12].mxu0 }
 0x67a   : > { %1345 = vrot.lane.b32.xlu0 %v1336_v30, %s1847_s25  ;;  %v1591_v31 = vpop.f32.mrb[13].mxu0 }
 0x67b   : > { %v1339_v32 = vpop.f32.mrb[14].mxu0 }
 0x67c   : > { %1347 = vrot.lane.b32.xlu1 %v1339_v32, %s1847_s25  ;;  %v1592_v33 = vpop.f32.mrb[15].mxu0 }
 0x6ec   : > { %v1346_v34 = vpop.permute.xlu0 %1345 }
 0x6ed   : > { %1352 = vst.msk [vmem:[%s2167_s17] sm:$0xff] %vm1351_vm1, %v1346_v34 }
 0x6ee   : > { %v1348_v35 = vpop.permute.xlu1 %1347 }
 0x6ef   : > { %1353 = vst.msk [vmem:[%s2167_s17 + $0x8] sm:$0xff] %vm1351_vm1, %v1348_v35 }
 0x6f0   : > { %1785 = shalt.err (!%p1782_p7)
}
 0x6f1   : > { %s1786_s22 = scalar_lea.hbm %s2296_s18, 256  ;;  %s1790_s25 = scalar_lea.hbm %s2353_s8, 512 }
 0x6f2   : > { %p1787_p8 = scmp.ne.s32.totalorder %s2296_s18, %s1786_s22  ;;  %p1791_p1 = scmp.lt.u32.totalorder %s2296_s18, %s2353_s8 }
 0x6f3   : > { %p1792_p0 = scmp.lt.u32.totalorder %s1790_s25, %s1786_s22  ;;  %p1794_p6 = scmp.lt.u32.totalorder %s1786_s22, %s2296_s18 }
 0x6f4   : > { %p1788_p11 = pnand %p1787_p8, %p2364_p9 }
 0x6f5   : > { %p1793_p5 = por %p1792_p0, %p1791_p1 }
 0x6f6   : > { %p1789_p13 = pneg %p1788_p11 }
 0x6f7   : > { %p1795_p10 = por %p1794_p6, %p1793_p5 }
 0x6f9   : > { %p1796_p12 = pnand %p1795_p10, %p1789_p13 }
 0x6fb   : > { %1799 = shalt.err (!%p1796_p12)
}
 0x6fc   : > { %s1849_s13 = smov 128   ;;  %s1850_s9 = smov 8  }
 0x6fd   : > { %1613 = dma.vmem_to_hbm [thread:$0]  (%p2364_p9), %s2298_s10, 256, %s2296_s18, %s2304_s21, %s1849_s13, %s1849_s13, %s1850_s9  }
 0x6fe PF: > { %p1625_p2 = scmp.ge.s32.totalorder %s1838_s30, 2  ;;  %s1383_s23 = sand.u32 1, %s1826_s27  }
 0x6ff   : > { %p2365_p3 = scmp.ne.s32.totalorder %s2358_s16, 0  ;;  %s1384_s19 = scalar_lea.sflag [#allocation5], %s1383_s23 }
 0x701   : > { %p1620_p4 = pnand %p1625_p2, %p2365_p3 }
 0x703   : > { %1821 = dma.done.wait (!%p1620_p4), %s1384_s19, 256  }
 0x704   : > { %1823 = vsyncadd (!%p1620_p4), %s1384_s19, 4294967040  ;;  %p19_p7 = scmp.ge.s32.totalorder %s1921_s11, 4   ;;  %s2366_s27 = smov %s1830_s28 }
 0x705   : > { %s2367_s28 = smov %s1834_s29  ;;  %s2368_s29 = smov %s1932_s14 }
 0x706   : > { %s2369_s30 = smov %s1921_s11  ;;  %21 = sbr.rel (!%p19_p7) target bundleno = 4 (0x4), region = 92 }
 0x70d   :  { %1389 = vsyncpa [#allocation4], 1 }
 0x70e   :  { %1391 = vsyncpa [#allocation4 + $0x1], 1 }
 0x70f   :  { %1392 = vsyncpa [#allocation5], 1 }
 0x710   :  { %1394 = vsyncpa [#allocation5 + $0x1], 1 }

// kernel: tpu_custom_call.1
= control target key start
LH: loop header
LB: loop body
LE: loop exit
PB: predicated region body
PF: predicated region fallthrough
CT: control target
= control target key end

     0   :  { %13 = vsyncpa [#allocation4], 0  ;;  %s2345_s0 = inlined_call_operand.vmem [shape: f32[32,16], index: 0, kind: input, shape index: {}]   ;;  %s2346_s1 = inlined_call_operand.hbm [shape: bf16[128,512], index: 1, kind: input, shape index: {}]   ;;  %s2347_s2 = inlined_call_operand.vmem [shape: bf16[16,128], index: 2, kind: input, shape index: {}]   ;;  %s2348_s3 = inlined_call_operand.vmem [shape: f32[1,128], index: 3, kind: input, shape index: {}]   ;;  %s2349_s4 = inlined_call_operand.vmem [shape: bf16[128,24], index: 4, kind: input, shape index: {}]   ;;  %s2350_s5 = inlined_call_operand.vmem [shape: bf16[40,128], index: 5, kind: input, shape index: {}]   ;;  %s2351_s6 = inlined_call_operand.vmem [shape: f32[1,128], index: 6, kind: input, shape index: {}]   ;;  %s2352_s7 = inlined_call_operand.vmem [shape: bf16[128,24], index: 7, kind: input, shape index: {}]   ;;  %s2353_s8 = inlined_call_operand.hbm [shape: f32[32,128], index: 8, kind: output, shape index: {}]  }
   0x1   :  { %14 = vsyncpa [#allocation5], 0 }
   0x2   :  { %16 = vsyncpa [#allocation5 + $0x1], 0  ;;  %s1896_s27 = smov 0   ;;  %s1898_s28 = smov 0  }
   0x3   :  { %s1900_s29 = smov 0   ;;  %s1902_s30 = smov 0  }
   0x4 LB: > { %s1917_s9 = sadd.s32 4294967295, %s1838_s30   ;;  %s1442_s10 = sadd.s32 4294967294, %s1838_s30   ;;  %s1838_s30 = sphi %s1902_s30, %s2369_s30   ;;  %s1834_s29 = sphi %s1900_s29, %s2368_s29   ;;  %s1830_s28 = sphi %s1898_s28, %s2367_s28   ;;  %s1826_s27 = sphi %s1896_s27, %s2366_s27  }
   0x5   : > { %s1921_s11 = sadd.s32 1, %s1838_s30   ;;  %s202_s12 = sadd.s32 1, %s1834_s29 }
   0x6   : > { %s199_s13 = ssub.s32 %s1838_s30, %s1921_s11  ;;  %p212_p0 = scmp.ne.s32.totalorder %s1834_s29, %s1830_s28 }
   0x7   : > { %p200_p1 = scmp.eq.s32.totalorder %s199_s13, 0  ;;  %p213_p2 = scmp.eq.s32.totalorder %s1917_s9, 1 }
   0x8   : > { %p218_p3 = scmp.ne.s32.totalorder %s1830_s28, %s1826_s27  ;;  %p219_p4 = scmp.eq.s32.totalorder %s1442_s10, 1 }
   0x9   : > { %s1932_s14 = scalar_select %p200_p1, %s1834_s29, %s202_s12  }
   0xa   : > { %p1934_p5 = por %p213_p2, %p212_p0  ;;  %p1938_p6 = por %p219_p4, %p218_p3 }
   0xb   : > { %p1443_p7 = scmp.ge.s32.totalorder %s1838_s30, 1  ;;  %p226_p8 = scmp.lt.s32.totalorder %s1838_s30, 3 }
   0xc   : > { %s2357_s15 = scalar_select %p1934_p5, 1, 0 }
   0xd   : > { %s2358_s16 = scalar_select %p1938_p6, 1, 0 }
   0xe   : > { %p2354_p9 = scmp.eq.s32.totalorder %s1917_s9, 0  ;;  %p1945_p10 = pnand %p1443_p7, %p226_p8 }
   0xf   : > { %s1840_s18 = smov [#allocation3]   ;;  %s1744_s23 = scalar_lea.hbm %s2346_s1, 4096 }
  0x10   : > { %s2359_s17 = scalar_select %p1945_p10, 1, 0 }
  0x11   : > { %s238_s19 = sshll.u32 %s1840_s18, 4  ;;  %p1615_p11 = pneg %p1945_p10  ;;  %s239_s19 = int_to_ptr.vmem [resolvable:$true] %s238_s19 }
  0x12   : > { %p1745_p13 = scmp.ne.s32.totalorder %s2346_s1, %s1744_s23  ;;  %p1751_p3 = scmp.lt.u32.totalorder %s1744_s23, %s2346_s1 }
  0x13   : > { %p1953_p12 = pnand %p2354_p9, %p1615_p11 }
  0x15   : > { %p1746_p0 = pneg %p1953_p12 }
  0x17   : > { %p1747_p1 = pnand %p1746_p0, %p1745_p13 }
  0x19   : > { %p1748_p2 = pneg %p1747_p1 }
  0x1b   : > { %p1753_p4 = pnand %p1751_p3, %p1748_p2 }
  0x1d   : > { %1756 = shalt.err (!%p1753_p4)
}
  0x1e   : > { %s1757_s12 = scalar_lea.vmem %s239_s19, 4096  ;;  %p1765_p9 = scmp.lt.s32.totalorder %s239_s19, %s239_s19 }
  0x1f   : > { %p1758_p7 = scmp.ne.s32.totalorder %s239_s19, %s1757_s12  ;;  %p1766_p6 = scmp.lt.s32.totalorder %s1757_s12, %s1757_s12 }
  0x21   : > { %p1760_p8 = pnand %p1758_p7, %p1746_p0  ;;  %p1767_p5 = por %p1766_p6, %p1765_p9 }
  0x23   : > { %p1761_p11 = pneg %p1760_p8 }
  0x25   : > { %p1768_p10 = pnand %p1767_p5, %p1761_p11 }
  0x27   : > { %1771 = shalt.err (!%p1768_p10)
}
  0x28   : > { %s1841_s13 = smov 256   ;;  %s1842_s18 = smov 16  }
  0x29   : > { %1618 = dma.hbm_to_vmem [thread:$0]  (!%p1953_p12), %s2346_s1, 4096, %s239_s19, [#allocation4], %s1841_s13, %s1841_s13, %s1842_s18  }
  0x2a   : > { %p2361_p13 = scmp.ne.s32.totalorder %s2359_s17, 0 }
  0x2b   : > { %p2362_p1 = scmp.eq.s32.totalorder (!%p2361_p13), %s1917_s9, 0 }
  0x2c   : > { %281 = sbr.rel (%p2361_p13) target bundleno = 1790 (0x6fe), region = 52 }
  0x33   : > { %1817 = dma.done.wait (%p2362_p1), [#allocation4], 4096   ;;  %p2363_p0 = pmov %p2362_p1 }
  0x34   : > { %s1449_s23 = sshll.u32 %s1917_s9, 1  ;;  %vm323_vm0 = vcmask 326656   ;;  %v1843_v0 = vmov 0.0   ;;  %vm1844_vm1 = vmmov 0   ;;  %v1845_v1 = vmov 0   ;;  %v1668_v2 = vld [vmem:[%s2347_s2] sm:$0xff]  }
  0x35   : > { %1819 = vsyncadd (%p2363_p0), [#allocation4], 4294963200  ;;  %1537 = vmatprep.subr.bf16.mxu1 %v1843_v0  ;;  %1539 = vmatprep.mubr.msk.bf16.mxu1 %vm1844_vm1, %v1843_v0  ;;  %p316_p5 = scmp.lt.s32.totalorder %s1449_s23, 3  ;;  %324 = vst.msk [vmem:[#allocation2] sm:$0xff] %vm323_vm0, %v1845_v1  ;;  %vm328_vm2 = vcmask 130048   ;;  %s312_s22 = sand.u32 1, %s1830_s28  }
  0x36   : > { %712 = vmatprep.mubr.bf16.mxu0 %v1845_v1  ;;  %1538 = vmatpush3.bf16.msra.mxu1 %v1668_v2  ;;  %v1993_v7 = vld [vmem:[#allocation3 + $0x4] ss:$16 sps:$4 sm:$0xff]   ;;  %v1995_v8 = vld [vmem:[#allocation3 + $0xc] ss:$16 sps:$4 sm:$0xff]   ;;  %v1997_v9 = vld [vmem:[#allocation3] ss:$16 sps:$4 sm:$0xff]  }
  0x37   : > { %s2371_s23 = smov (!%p316_p5, %s1449_s23), 3  ;;  %v1999_v10 = vld [vmem:[#allocation3 + $0x8] ss:$16 sps:$4 sm:$0xff]   ;;  %637 = vmatprep.subr.bf16.mxu1 %v1993_v7  ;;  %680 = vmatprep.subr.bf16.mxu0 %v1995_v8  ;;  %v2005_v11 = vld [vmem:[#allocation3 + $0x24] ss:$16 sps:$4 sm:$0xff]   ;;  %vm330_vm11 = vcmask 1047936  }
  0x38   : > { %s1450_s17 = sshll.u32 %s2371_s23, 3  ;;  %681 = vmatpush1.bf16.msra.mxu0 %v1999_v10  ;;  %v2007_v12 = vld [vmem:[#allocation3 + $0x2c] ss:$16 sps:$4 sm:$0xff]   ;;  %v2009_v13 = vld [vmem:[#allocation3 + $0x20] ss:$16 sps:$4 sm:$0xff]   ;;  %s1448_s23 = sshll.u32 %s312_s22, 4 }
  0x39   : > { %s319_s24 = scalar_lea.vmem %s2345_s0, %s1450_s17  ;;  %v2011_v14 = vld [vmem:[#allocation3 + $0x28] ss:$16 sps:$4 sm:$0xff]   ;;  %682 = vmatprep.subr.bf16.mxu0 %v2007_v12  ;;  %v2017_v15 = vld [vmem:[#allocation3 + $0x44] ss:$16 sps:$4 sm:$0xff]   ;;  %v2019_v16 = vld [vmem:[#allocation3 + $0x4c] ss:$16 sps:$4 sm:$0xff]  }
  0x3a   : > { %v325_v3 = vld [vmem:[%s319_s24] sm:$0xff]  ;;  %v326_v4 = vld [vmem:[%s319_s24 + $0x8] sm:$0xff]  ;;  %s2167_s17 = scalar_lea.vmem [#allocation6], %s1448_s23  ;;  %vm955_vm12 = vcmask 1043456   ;;  %vm921_vm13 = vcmask 195584   ;;  %s1846_s12 = smov 16  }
  0x3b   : > { %v327_v5 = vpack.c.bf16 %v326_v4, %v325_v3  ;;  %v2021_v17 = vld [vmem:[#allocation3 + $0x40] ss:$16 sps:$4 sm:$0xff]   ;;  %v2023_v18 = vld [vmem:[#allocation3 + $0x48] ss:$16 sps:$4 sm:$0xff]   ;;  %v2029_v19 = vld [vmem:[#allocation3 + $0x64] ss:$16 sps:$4 sm:$0xff]  }
  0x3c   : > { %683 = vmatpush1.bf16.msra.mxu0 %v2011_v14  ;;  %v2031_v20 = vld [vmem:[#allocation3 + $0x6c] ss:$16 sps:$4 sm:$0xff]   ;;  %v2033_v21 = vld [vmem:[#allocation3 + $0x60] ss:$16 sps:$4 sm:$0xff]   ;;  %v2035_v22 = vld [vmem:[#allocation3 + $0x68] ss:$16 sps:$4 sm:$0xff]  }
  0x3d   : > { %329 = vst.msk [vmem:[#allocation2] sm:$0xff] %vm328_vm2, %v327_v5  ;;  %684 = vmatprep.subr.bf16.mxu0 %v2019_v16  ;;  %v2041_v23 = vld [vmem:[#allocation3 + $0x84] ss:$16 sps:$4 sm:$0xff]   ;;  %v2043_v24 = vld [vmem:[#allocation3 + $0x8c] ss:$16 sps:$4 sm:$0xff]   ;;  %vm929_vm14 = vcmask 326784  }
  0x3e   : > { %v2045_v25 = vld [vmem:[#allocation3 + $0x80] ss:$16 sps:$4 sm:$0xff]   ;;  %v2047_v26 = vld [vmem:[#allocation3 + $0x88] ss:$16 sps:$4 sm:$0xff]   ;;  %v2053_v27 = vld [vmem:[#allocation3 + $0xa4] ss:$16 sps:$4 sm:$0xff]  }
  0x3f   : > { %v2055_v28 = vld [vmem:[#allocation3 + $0xac] ss:$16 sps:$4 sm:$0xff]   ;;  %v2057_v29 = vld [vmem:[#allocation3 + $0xa0] ss:$16 sps:$4 sm:$0xff]   ;;  %v2059_v30 = vld [vmem:[#allocation3 + $0xa8] ss:$16 sps:$4 sm:$0xff]  }
  0x40   : > { %685 = vmatpush1.bf16.msra.mxu0 %v2023_v18  ;;  %v2065_v31 = vld [vmem:[#allocation3 + $0xc4] ss:$16 sps:$4 sm:$0xff]   ;;  %v2067_v32 = vld [vmem:[#allocation3 + $0xcc] ss:$16 sps:$4 sm:$0xff]   ;;  %v2069_v33 = vld [vmem:[#allocation3 + $0xc0] ss:$16 sps:$4 sm:$0xff]  }
  0x41   : > { %686 = vmatprep.subr.bf16.mxu0 %v2031_v20  ;;  %v2071_v34 = vld [vmem:[#allocation3 + $0xc8] ss:$16 sps:$4 sm:$0xff]   ;;  %v2077_v35 = vld [vmem:[#allocation3 + $0xe4] ss:$16 sps:$4 sm:$0xff]   ;;  %v2079_v36 = vld [vmem:[#allocation3 + $0xec] ss:$16 sps:$4 sm:$0xff]  }
  0x42   : > { %v2081_v37 = vld [vmem:[#allocation3 + $0xe0] ss:$16 sps:$4 sm:$0xff]   ;;  %v2083_v38 = vld [vmem:[#allocation3 + $0xe8] ss:$16 sps:$4 sm:$0xff]   ;;  %331 = vst.msk [vmem:[%s2167_s17] sm:$0xff] %vm330_vm11, %v1843_v0  ;;  %332 = vst.msk [vmem:[%s2167_s17 + $0x8] sm:$0xff] %vm330_vm11, %v1843_v0 }
  0x43   : > { %v1453_v39 = vld [vmem:[%s2348_s3] ss:$0 sm:$0xff]  ;;  %s1847_s25 = smov 24   ;;  %s1512_s26 = sshll.u32 %s1917_s9, 8 }
  0x44   : > { %v365_v6 = vld [vmem:[#allocation2] sm:$0xff]  ;;  %687 = vmatpush1.bf16.msra.mxu0 %v2035_v22  ;;  %s1368_s10 = sshll.u32 %s2167_s17, 4  ;;  %s2296_s18 = scalar_lea.hbm %s2353_s8, %s1512_s26  ;;  %s2298_s10 = int_to_ptr.vmem [resolvable:$true] %s1368_s10 }
  0x45   : > { %1540 = vmatmul.mubr.msk.bf16.vlgmr.msra.gmra.mrb[0].mxu1 %vm328_vm2, %v365_v6  ;;  %688 = vmatprep.subr.bf16.mxu0 %v2043_v24  ;;  %s2304_s21 = scalar_lea.sflag [#allocation5], %s312_s22  ;;  %s1772_s9 = scalar_lea.vmem %s2298_s10, 256 }
  0x46   : > { %669 = vmatprep.mubr.bf16.mxu1 %v1845_v1  ;;  %638 = vmatpush1.bf16.msra.mxu1 %v1997_v9  ;;  %p1773_p6 = scmp.ne.s32.totalorder %s2298_s10, %s1772_s9  ;;  %p2364_p9 = scmp.ne.s32.totalorder %s2357_s15, 0 }
  0x47   : > { %639 = vmatprep.subr.bf16.mxu1 %v2005_v11  ;;  %s1848_s23 = smov [#allocation6]  }
  0x48   : > { %689 = vmatpush1.bf16.msra.mxu0 %v2047_v26  ;;  %p1774_p10 = pnand %p1773_p6, %p2364_p9  ;;  %s1776_s19 = sshll.u32 %s1848_s23, 4  ;;  %s1777_s19 = int_to_ptr.vmem [resolvable:$false] %s1776_s19 }
  0x49   : > { %690 = vmatprep.subr.bf16.mxu0 %v2055_v28  ;;  %s1778_s20 = scalar_lea.vmem %s1777_s19, 512  ;;  %p1779_p2 = scmp.lt.s32.totalorder %s2298_s10, %s1777_s19 }
  0x4a   : > { %640 = vmatpush1.bf16.msra.mxu1 %v2009_v13  ;;  %p1775_p12 = pneg %p1774_p10  ;;  %p1780_p3 = scmp.lt.s32.totalorder %s1778_s20, %s1772_s9 }
  0x4b   : > { %641 = vmatprep.subr.bf16.mxu1 %v2017_v15 }
  0x4c   : > { %691 = vmatpush1.bf16.msra.mxu0 %v2059_v30  ;;  %p1781_p4 = por %p1780_p3, %p1779_p2 }
  0x4d   : > { %692 = vmatprep.subr.bf16.mxu0 %v2067_v32 }
  0x4e   : > { %642 = vmatpush1.bf16.msra.mxu1 %v2021_v17  ;;  %p1782_p7 = pnand %p1781_p4, %p1775_p12 }
  0x4f   : > { %643 = vmatprep.subr.bf16.mxu1 %v2029_v19 }
  0x50   : > { %693 = vmatpush1.bf16.msra.mxu0 %v2071_v34 }
  0x51   : > { %694 = vmatprep.subr.bf16.mxu0 %v2079_v36 }
  0x52   : > { %644 = vmatpush1.bf16.msra.mxu1 %v2033_v21 }
  0x53   : > { %645 = vmatprep.subr.bf16.mxu1 %v2041_v23 }
  0x54   : > { %695 = vmatpush1.bf16.msra.mxu0 %v2083_v38 }
  0x55   : > { %766 = vmatprep.subr.bf16.mxu0 %v1995_v8 }
  0x56   : > { %646 = vmatpush1.bf16.msra.mxu1 %v2045_v25 }
  0x57   : > { %647 = vmatprep.subr.bf16.mxu1 %v2053_v27 }
  0x5a   : > { %648 = vmatpush1.bf16.msra.mxu1 %v2057_v29 }
  0x5b   : > { %649 = vmatprep.subr.bf16.mxu1 %v2065_v31 }
  0x5e   : > { %650 = vmatpush1.bf16.msra.mxu1 %v2069_v33 }
  0x5f   : > { %651 = vmatprep.subr.bf16.mxu1 %v2077_v35 }
  0x62   : > { %652 = vmatpush1.bf16.msra.mxu1 %v2081_v37 }
  0x63   : > { %723 = vmatprep.subr.bf16.mxu1 %v1993_v7 }
 0x118   : > { %v411_v40 = vpop.f32.mrb[0].mxu1 }
 0x119   : > { %v425_v41 = vsub.f32 %v411_v40, %v1453_v39  ;;  %v1541_v42 = vpop.f32.mrb[1].mxu1 }
 0x11a   : > { %v414_v43 = vpop.f32.mrb[2].mxu1 }
 0x11b   : > { %v427_v44 = vand.u32 2147483647, %v425_v41  ;;  %v426_v45 = vsub.f32 %v414_v43, %v1453_v39  ;;  %v1542_v46 = vpop.f32.mrb[3].mxu1  ;;  %vm429_vm9 = vcmp.ge.f32.partialorder %v425_v41, 0.0  ;;  %v1717_v41 = vld [vmem:[%s2349_s4] sm:$0xff]  }
 0x11d   : > { %v431_v47 = vmul.f32 %v427_v44, %v427_v44  ;;  %v428_v48 = vand.u32 2147483647, %v426_v45  ;;  %vm430_vm10 = vcmp.ge.f32.partialorder %v426_v45, 0.0  ;;  %v1718_v45 = vld [vmem:[%s2349_s4 + $0x8] sm:$0xff]  }
 0x11f   : > { %v433_v49 = vsub.f32 8.0, %v431_v47  ;;  %v432_v50 = vmul.f32 %v428_v48, %v428_v48 }
 0x121   : > { %v435_v51 = vmax.f32 %v433_v49, 0.0  ;;  %v434_v52 = vsub.f32 8.0, %v432_v50 }
 0x123   : > { %1736 = vrsqrt.f32 %v435_v51  ;;  %v436_v53 = vmax.f32 %v434_v52, 0.0  ;;  %vm439_vm3 = vcmp.eq.f32.partialorder %v435_v51, inf  ;;  %v442_v56 = vand.u32 2147483648, %v435_v51 }
 0x124   : > { %vm441_vm4 = vcmp.eq.f32.partialorder %v435_v51, 0.0 }
 0x125   : > { %1738 = vrsqrt.f32 %v436_v53  ;;  %vm446_vm5 = vcmp.eq.f32.partialorder %v436_v53, inf  ;;  %v449_v62 = vand.u32 2147483648, %v436_v53  ;;  %vm448_vm6 = vcmp.eq.f32.partialorder %v436_v53, 0.0 }
 0x12d   : > { %v1737_v54 = vpop.eup %1736 }
 0x12e   : > { %v438_v55 = vmul.f32 %v1737_v54, %v435_v51 }
 0x12f   : > { %v1739_v57 = vpop.eup %1738 }
 0x130   : > { %v440_v58 = vsel %vm439_vm3, %v435_v51, %v438_v55  ;;  %v445_v60 = vmul.f32 %v1739_v57, %v436_v53 }
 0x131   : > { %v443_v59 = vsel %vm441_vm4, %v442_v56, %v440_v58 }
 0x132   : > { %v451_v61 = vadd.f32 %v443_v59, %v427_v44  ;;  %v447_v63 = vsel %vm446_vm5, %v436_v53, %v445_v60 }
 0x133   : > { %v450_v3 = vsel %vm448_vm6, %v449_v62, %v447_v63  ;;  %v1721_v62 = vld [vmem:[%s2349_s4 + $0x20] sm:$0xff]   ;;  %v1722_v63 = vld [vmem:[%s2349_s4 + $0x28] sm:$0xff]  }
 0x134   : > { %v453_v2 = vmul.f32 0.5, %v451_v61  ;;  %v452_v4 = vadd.f32 %v450_v3, %v428_v48  ;;  %v1720_v61 = vld [vmem:[%s2349_s4 + $0x18] sm:$0xff]  }
 0x135   : > { %v1724_v3 = vld [vmem:[%s2349_s4 + $0x38] sm:$0xff]  }
 0x136   : > { %vm455_vm7 = vcmp.le.f32.partialorder %v453_v2, %v427_v44  ;;  %v454_v6 = vmul.f32 0.5, %v452_v4 }
 0x137   : > { %v457_v5 = vsel %vm455_vm7, 2.0, %v453_v2  ;;  %v1723_v2 = vld [vmem:[%s2349_s4 + $0x30] sm:$0xff]  }
 0x138   : > { %v459_v39 = vsub.f32 %v457_v5, %v427_v44  ;;  %vm456_vm8 = vcmp.le.f32.partialorder %v454_v6, %v428_v48 }
 0x139   : > { %v458_v42 = vsel %vm456_vm8, 2.0, %v454_v6 }
 0x13a   : > { %v461_v40 = vmax.f32 %v459_v39, 0.0  ;;  %v460_v43 = vsub.f32 %v458_v42, %v428_v48  ;;  %v1719_v48 = vld [vmem:[%s2349_s4 + $0x10] sm:$0xff]  }
 0x13c   : > { %v463_v46 = vmul.f32 %v461_v40, %v461_v40  ;;  %v462_v47 = vmax.f32 %v460_v43, 0.0 }
 0x13e   : > { %v465_v49 = vmul.f32 0.25, %v463_v46  ;;  %v464_v50 = vmul.f32 %v462_v47, %v462_v47 }
 0x140   : > { %v467_v51 = vsub.f32 1.0, %v465_v49  ;;  %v466_v52 = vmul.f32 0.25, %v464_v50 }
 0x142   : > { %v468_v54 = vsub.f32 1.0, %v466_v52  ;;  %v469_v53 = vsel %vm429_vm9, %v467_v51, %v465_v49 }
 0x144   : > { %v470_v55 = vsel %vm430_vm10, %v468_v54, %v466_v52 }
 0x145   : > { %v471_v56 = vpack.c.bf16 %v470_v55, %v469_v53 }
 0x147   : > { %v473_v57 = vunpack.c.h.bf16 %v471_v56  ;;  %v472_v58 = vunpack.c.l.bf16 %v471_v56 }
 0x149   : > { %v475_v59 = vsub.f32 %v470_v55, %v473_v57  ;;  %v474_v44 = vsub.f32 %v469_v53, %v472_v58  ;;  %v1725_v55 = vld [vmem:[%s2350_s5] sm:$0xff]   ;;  %v1727_v57 = vld [vmem:[%s2350_s5 + $0x10] ss:$0 sps:$4 sm:$0xff]  }
 0x14b   : > { %v476_v60 = vpack.c.bf16 %v475_v59, %v474_v44 }
 0x14d   : > { %670 = vmatmul.mubr.bf16.vlgmr.msra.gmra.mrb[4].mxu1 %v476_v60  ;;  %713 = vmatmul.mubr.bf16.vlgmr.msra.gmra.mrb[0].mxu0 %v476_v60 }
 0x14e   : > { %724 = vmatpush1.bf16.msra.mxu1 %v1997_v9  ;;  %767 = vmatpush1.bf16.msra.mxu0 %v1999_v10 }
 0x14f   : > { %725 = vmatprep.subr.bf16.mxu1 %v2005_v11  ;;  %768 = vmatprep.subr.bf16.mxu0 %v2007_v12 }
 0x150   : > { %755 = vmatprep.mubr.bf16.mxu1 %v1845_v1  ;;  %798 = vmatprep.mubr.bf16.mxu0 %v1845_v1 }
 0x152   : > { %726 = vmatpush1.bf16.msra.mxu1 %v2009_v13  ;;  %769 = vmatpush1.bf16.msra.mxu0 %v2011_v14 }
 0x153   : > { %727 = vmatprep.subr.bf16.mxu1 %v2017_v15  ;;  %770 = vmatprep.subr.bf16.mxu0 %v2019_v16 }
 0x156   : > { %728 = vmatpush1.bf16.msra.mxu1 %v2021_v17  ;;  %771 = vmatpush1.bf16.msra.mxu0 %v2023_v18 }
 0x157   : > { %729 = vmatprep.subr.bf16.mxu1 %v2029_v19  ;;  %772 = vmatprep.subr.bf16.mxu0 %v2031_v20 }
 0x15a   : > { %730 = vmatpush1.bf16.msra.mxu1 %v2033_v21  ;;  %773 = vmatpush1.bf16.msra.mxu0 %v2035_v22 }
 0x15b   : > { %731 = vmatprep.subr.bf16.mxu1 %v2041_v23  ;;  %774 = vmatprep.subr.bf16.mxu0 %v2043_v24 }
 0x15e   : > { %732 = vmatpush1.bf16.msra.mxu1 %v2045_v25  ;;  %775 = vmatpush1.bf16.msra.mxu0 %v2047_v26 }
 0x15f   : > { %733 = vmatprep.subr.bf16.mxu1 %v2053_v27  ;;  %776 = vmatprep.subr.bf16.mxu0 %v2055_v28 }
 0x162   : > { %734 = vmatpush1.bf16.msra.mxu1 %v2057_v29  ;;  %777 = vmatpush1.bf16.msra.mxu0 %v2059_v30 }
 0x163   : > { %735 = vmatprep.subr.bf16.mxu1 %v2065_v31  ;;  %778 = vmatprep.subr.bf16.mxu0 %v2067_v32 }
 0x166   : > { %736 = vmatpush1.bf16.msra.mxu1 %v2069_v33  ;;  %779 = vmatpush1.bf16.msra.mxu0 %v2071_v34 }
 0x167   : > { %737 = vmatprep.subr.bf16.mxu1 %v2077_v35  ;;  %780 = vmatprep.subr.bf16.mxu0 %v2079_v36 }
 0x16a   : > { %738 = vmatpush1.bf16.msra.mxu1 %v2081_v37  ;;  %781 = vmatpush1.bf16.msra.mxu0 %v2083_v38 }
 0x16b   : > { %1543 = vmatprep.subr.bf16.mxu1 %v1843_v0  ;;  %1563 = vmatprep.subr.bf16.mxu0 %v1843_v0 }
 0x16d   : > { %756 = vmatmul.mubr.bf16.vlgmr.msra.gmra.mrb[4].mxu1 %v471_v56  ;;  %799 = vmatmul.mubr.bf16.vlgmr.msra.gmra.mrb[0].mxu0 %v471_v56  ;;  %v1726_v56 = vld [vmem:[%s2350_s5 + $0x8] sm:$0xff]  }
 0x16e   : > { %1544 = vmatpush3.bf16.msra.mxu1 %v1717_v41  ;;  %1559 = vmatprep.mubr.msk.bf16.mxu1 %vm1844_vm1, %v1843_v0 }
 0x16f   : > { %1545 = vmatprep.subr.bf16.mxu1 %v1843_v0  ;;  %1569 = vmatprep.mubr.msk.bf16.mxu0 %vm1844_vm1, %v1843_v0 }
 0x170   : > { %1564 = vmatpush3.bf16.msra.mxu0 %v1725_v55 }
 0x171   : > { %1565 = vmatprep.subr.bf16.mxu0 %v1843_v0 }
 0x172   : > { %1546 = vmatpush3.bf16.msra.mxu1 %v1718_v45 }
 0x173   : > { %1547 = vmatprep.subr.bf16.mxu1 %v1843_v0 }
 0x174   : > { %1566 = vmatpush3.bf16.msra.mxu0 %v1726_v56 }
 0x175   : > { %1567 = vmatprep.subr.bf16.mxu0 %v1843_v0 }
 0x176   : > { %1548 = vmatpush3.bf16.msra.mxu1 %v1719_v48 }
 0x177   : > { %1549 = vmatprep.subr.bf16.mxu1 %v1843_v0 }
 0x17a   : > { %1550 = vmatpush3.bf16.msra.mxu1 %v1720_v61  ;;  %v1498_v61 = vld [vmem:[%s2351_s6] ss:$0 sm:$0xff] }
 0x17b   : > { %1551 = vmatprep.subr.bf16.mxu1 %v1843_v0 }
 0x17e   : > { %1552 = vmatpush3.bf16.msra.mxu1 %v1721_v62 }
 0x17f   : > { %1553 = vmatprep.subr.bf16.mxu1 %v1843_v0 }
 0x182   : > { %1554 = vmatpush3.bf16.msra.mxu1 %v1722_v63 }
 0x183   : > { %1555 = vmatprep.subr.bf16.mxu1 %v1843_v0 }
 0x186   : > { %1556 = vmatpush3.bf16.msra.mxu1 %v1723_v2 }
 0x187   : > { %1557 = vmatprep.subr.bf16.mxu1 %v1843_v0 }
 0x18a   : > { %1558 = vmatpush3.bf16.msra.mxu1 %v1724_v3 }
 0x18b   : > { %1102 = vmatprep.subr.bf16.mxu1 %v1995_v8 }
 0x240   : > { %v757_v4 = vpop.f32.mrb[4].mxu1  ;;  %v800_v5 = vpop.f32.mrb[0].mxu0 }
 0x241   : > { %v759_v6 = vpop.f32.mrb[5].mxu1  ;;  %v802_v39 = vpop.f32.mrb[1].mxu0 }
 0x242   : > { %v809_v40 = vmul.f32 %v759_v6, %v757_v4  ;;  %v761_v42 = vpop.f32.mrb[6].mxu1  ;;  %v804_v43 = vpop.f32.mrb[2].mxu0 }
 0x243   : > { %v763_v46 = vpop.f32.mrb[7].mxu1  ;;  %v806_v47 = vpop.f32.mrb[3].mxu0 }
 0x244   : > { %v811_v49 = vmul.f32 %v809_v40, %v800_v5  ;;  %v810_v50 = vmul.f32 %v763_v46, %v761_v42 }
 0x246   : > { %v813_v51 = vmul.f32 %v811_v49, %v802_v39  ;;  %v812_v52 = vmul.f32 %v810_v50, %v804_v43 }
 0x248   : > { %v814_v54 = vmul.f32 %v812_v52, %v806_v47 }
 0x24a   : > { %v815_v53 = vpack.c.bf16 %v814_v54, %v813_v51 }
 0x24c   : > { %1560 = vmatmul.mubr.bf16.vlgmr.msra.gmra.mrb[8].mxu1 %v815_v53 }
 0x24d   : > { %1103 = vmatpush1.bf16.msra.mxu1 %v1999_v10  ;;  %1134 = vmatprep.mubr.bf16.mxu1 %v1845_v1 }
 0x24e   : > { %1104 = vmatprep.subr.bf16.mxu1 %v2007_v12 }
 0x251   : > { %1105 = vmatpush1.bf16.msra.mxu1 %v2011_v14 }
 0x252   : > { %1106 = vmatprep.subr.bf16.mxu1 %v2019_v16 }
 0x255   : > { %1107 = vmatpush1.bf16.msra.mxu1 %v2023_v18 }
 0x256   : > { %1108 = vmatprep.subr.bf16.mxu1 %v2031_v20 }
 0x259   : > { %1109 = vmatpush1.bf16.msra.mxu1 %v2035_v22 }
 0x25a   : > { %1110 = vmatprep.subr.bf16.mxu1 %v2043_v24 }
 0x25d   : > { %1111 = vmatpush1.bf16.msra.mxu1 %v2047_v26 }
 0x25e   : > { %1112 = vmatprep.subr.bf16.mxu1 %v2055_v28 }
 0x261   : > { %1113 = vmatpush1.bf16.msra.mxu1 %v2059_v30 }
 0x262   : > { %1114 = vmatprep.subr.bf16.mxu1 %v2067_v32 }
 0x265   : > { %1115 = vmatpush1.bf16.msra.mxu1 %v2071_v34 }
 0x266   : > { %1116 = vmatprep.subr.bf16.mxu1 %v2079_v36 }
 0x269   : > { %1117 = vmatpush1.bf16.msra.mxu1 %v2083_v38 }
 0x26a   : > { %1188 = vmatprep.subr.bf16.mxu1 %v1995_v8  ;;  %v957_v8 = vsel %vm955_vm12, %v1727_v57, 0 }
 0x26b   : > { %1568 = vmatpush3.bf16.msra.mxu0 %v957_v8 }
 0x26c   : > { %1059 = vmatprep.subr.bf16.mxu0 %v1993_v7 }
 0x31f   : > { %v914_v58 = vpop.f32.mrb[8].mxu1 }
 0x320   : > { %922 = vst.msk [vmem:[%s2167_s17] sm:$0xff] %vm921_vm13, %v914_v58  ;;  %v1561_v59 = vpop.f32.mrb[9].mxu1 }
 0x321   : > { %v917_v44 = vpop.f32.mrb[10].mxu1 }
 0x322   : > { %923 = vst.msk [vmem:[%s2167_s17 + $0x8] sm:$0xff] %vm921_vm13, %v917_v44  ;;  %v1562_v60 = vpop.f32.mrb[11].mxu1  ;;  %v924_v41 = vpack.c.bf16 %v917_v44, %v914_v58 }
 0x324   : > { %926 = vrot.lane.b32.xlu0 %v924_v41, %s1846_s12 }
 0x396   : > { %v927_v45 = vpop.permute.xlu0 %926 }
 0x397   : > { %930 = vst.msk [vmem:[#allocation2] sm:$0xff] %vm929_vm14, %v927_v45 }
 0x39e   : > { %v931_v48 = vld [vmem:[#allocation2] sm:$0xff] }
 0x39f   : > { %1570 = vmatmul.mubr.msk.bf16.vlgmr.msra.gmra.mrb[4].mxu0 %vm323_vm0, %v931_v48 }
 0x3a0   : > { %1060 = vmatpush1.bf16.msra.mxu0 %v1997_v9  ;;  %1091 = vmatprep.mubr.bf16.mxu0 %v1845_v1 }
 0x3a1   : > { %1061 = vmatprep.subr.bf16.mxu0 %v2005_v11 }
 0x3a4   : > { %1062 = vmatpush1.bf16.msra.mxu0 %v2009_v13 }
 0x3a5   : > { %1063 = vmatprep.subr.bf16.mxu0 %v2017_v15 }
 0x3a8   : > { %1064 = vmatpush1.bf16.msra.mxu0 %v2021_v17 }
 0x3a9   : > { %1065 = vmatprep.subr.bf16.mxu0 %v2029_v19 }
 0x3ac   : > { %1066 = vmatpush1.bf16.msra.mxu0 %v2033_v21 }
 0x3ad   : > { %1067 = vmatprep.subr.bf16.mxu0 %v2041_v23 }
 0x3b0   : > { %1068 = vmatpush1.bf16.msra.mxu0 %v2045_v25 }
 0x3b1   : > { %1069 = vmatprep.subr.bf16.mxu0 %v2053_v27 }
 0x3b4   : > { %1070 = vmatpush1.bf16.msra.mxu0 %v2057_v29 }
 0x3b5   : > { %1071 = vmatprep.subr.bf16.mxu0 %v2065_v31 }
 0x3b8   : > { %1072 = vmatpush1.bf16.msra.mxu0 %v2069_v33 }
 0x3b9   : > { %1073 = vmatprep.subr.bf16.mxu0 %v2077_v35 }
 0x3bc   : > { %1074 = vmatpush1.bf16.msra.mxu0 %v2081_v37 }
 0x3bd   : > { %1145 = vmatprep.subr.bf16.mxu0 %v1993_v7 }
 0x472   : > { %v993_v62 = vpop.f32.mrb[4].mxu0 }
 0x473   : > { %v1007_v63 = vsub.f32 %v993_v62, %v1498_v61  ;;  %v1571_v2 = vpop.f32.mrb[5].mxu0 }
 0x474   : > { %v996_v3 = vpop.f32.mrb[6].mxu0 }
 0x475   : > { %v1009_v4 = vand.u32 2147483647, %v1007_v63  ;;  %v1008_v5 = vsub.f32 %v996_v3, %v1498_v61  ;;  %v1572_v6 = vpop.f32.mrb[7].mxu0  ;;  %vm1011_vm6 = vcmp.ge.f32.partialorder %v1007_v63, 0.0 }
 0x477   : > { %v1013_v39 = vmul.f32 %v1009_v4, %v1009_v4  ;;  %v1010_v40 = vand.u32 2147483647, %v1008_v5  ;;  %vm1012_vm7 = vcmp.ge.f32.partialorder %v1008_v5, 0.0 }
 0x479   : > { %v1015_v42 = vsub.f32 8.0, %v1013_v39  ;;  %v1014_v43 = vmul.f32 %v1010_v40, %v1010_v40 }
 0x47b   : > { %v1017_v46 = vmax.f32 %v1015_v42, 0.0  ;;  %v1016_v47 = vsub.f32 8.0, %v1014_v43 }
 0x47d   : > { %1740 = vrsqrt.f32 %v1017_v46  ;;  %v1018_v49 = vmax.f32 %v1016_v47, 0.0  ;;  %vm1021_vm15 = vcmp.eq.f32.partialorder %v1017_v46, inf  ;;  %v1024_v51 = vand.u32 2147483648, %v1017_v46 }
 0x47e   : > { %vm1023_vm0 = vcmp.eq.f32.partialorder %v1017_v46, 0.0 }
 0x47f   : > { %1742 = vrsqrt.f32 %v1018_v49  ;;  %vm1028_vm2 = vcmp.eq.f32.partialorder %v1018_v49, inf  ;;  %v1031_v57 = vand.u32 2147483648, %v1018_v49  ;;  %vm1030_vm3 = vcmp.eq.f32.partialorder %v1018_v49, 0.0 }
 0x487   : > { %v1741_v7 = vpop.eup %1740 }
 0x488   : > { %v1020_v50 = vmul.f32 %v1741_v7, %v1017_v46 }
 0x489   : > { %v1743_v52 = vpop.eup %1742 }
 0x48a   : > { %v1022_v54 = vsel %vm1021_vm15, %v1017_v46, %v1020_v50  ;;  %v1027_v55 = vmul.f32 %v1743_v52, %v1018_v49 }
 0x48b   : > { %v1025_v53 = vsel %vm1023_vm0, %v1024_v51, %v1022_v54 }
 0x48c   : > { %v1033_v56 = vadd.f32 %v1025_v53, %v1009_v4  ;;  %v1029_v8 = vsel %vm1028_vm2, %v1018_v49, %v1027_v55 }
 0x48d   : > { %v1032_v59 = vsel %vm1030_vm3, %v1031_v57, %v1029_v8 }
 0x48e   : > { %v1035_v58 = vmul.f32 0.5, %v1033_v56  ;;  %v1034_v44 = vadd.f32 %v1032_v59, %v1010_v40 }
 0x490   : > { %vm1037_vm4 = vcmp.le.f32.partialorder %v1035_v58, %v1009_v4  ;;  %v1036_v41 = vmul.f32 0.5, %v1034_v44 }
 0x491   : > { %v1039_v60 = vsel %vm1037_vm4, 2.0, %v1035_v58 }
 0x492   : > { %v1041_v45 = vsub.f32 %v1039_v60, %v1009_v4  ;;  %vm1038_vm5 = vcmp.le.f32.partialorder %v1036_v41, %v1010_v40 }
 0x493   : > { %v1040_v61 = vsel %vm1038_vm5, 2.0, %v1036_v41 }
 0x494   : > { %v1043_v48 = vmax.f32 %v1041_v45, 0.0  ;;  %v1042_v62 = vsub.f32 %v1040_v61, %v1010_v40 }
 0x496   : > { %v1045_v2 = vmul.f32 %v1043_v48, %v1043_v48  ;;  %v1044_v3 = vmax.f32 %v1042_v62, 0.0 }
 0x498   : > { %v1047_v6 = vmul.f32 0.25, %v1045_v2  ;;  %v1046_v39 = vmul.f32 %v1044_v3, %v1044_v3 }
 0x49a   : > { %v1049_v42 = vsub.f32 1.0, %v1047_v6  ;;  %v1048_v43 = vmul.f32 0.25, %v1046_v39 }
 0x49c   : > { %v1050_v46 = vsub.f32 1.0, %v1048_v43  ;;  %v1051_v47 = vsel %vm1011_vm6, %v1049_v42, %v1047_v6 }
 0x49e   : > { %v1052_v49 = vsel %vm1012_vm7, %v1050_v46, %v1048_v43 }
 0x49f   : > { %v1053_v7 = vpack.c.bf16 %v1052_v49, %v1051_v47 }
 0x4a1   : > { %v1055_v50 = vunpack.c.h.bf16 %v1053_v7  ;;  %v1054_v51 = vunpack.c.l.bf16 %v1053_v7 }
 0x4a3   : > { %v1057_v52 = vsub.f32 %v1052_v49, %v1055_v50  ;;  %v1056_v4 = vsub.f32 %v1051_v47, %v1054_v51 }
 0x4a5   : > { %v1058_v54 = vpack.c.bf16 %v1057_v52, %v1056_v4 }
 0x4a7   : > { %1092 = vmatmul.mubr.bf16.vlgmr.msra.gmra.mrb[8].mxu0 %v1058_v54  ;;  %1135 = vmatmul.mubr.bf16.vlgmr.msra.gmra.mrb[12].mxu1 %v1058_v54 }
 0x4a8   : > { %1146 = vmatpush1.bf16.msra.mxu0 %v1997_v9  ;;  %1189 = vmatpush1.bf16.msra.mxu1 %v1999_v10  ;;  %v1729_v9 = vld [vmem:[%s2352_s7 + $0x8] sm:$0xff]   ;;  %v1730_v10 = vld [vmem:[%s2352_s7 + $0x10] sm:$0xff]  }
 0x4a9   : > { %1147 = vmatprep.subr.bf16.mxu0 %v2005_v11  ;;  %1190 = vmatprep.subr.bf16.mxu1 %v2007_v12  ;;  %v1731_v11 = vld [vmem:[%s2352_s7 + $0x18] sm:$0xff]   ;;  %v1732_v12 = vld [vmem:[%s2352_s7 + $0x20] sm:$0xff]  }
 0x4aa   : > { %1177 = vmatprep.mubr.bf16.mxu0 %v1845_v1  ;;  %1220 = vmatprep.mubr.bf16.mxu1 %v1845_v1  ;;  %v1728_v1 = vld [vmem:[%s2352_s7] sm:$0xff]  }
 0x4ac   : > { %1148 = vmatpush1.bf16.msra.mxu0 %v2009_v13  ;;  %1191 = vmatpush1.bf16.msra.mxu1 %v2011_v14  ;;  %v1733_v13 = vld [vmem:[%s2352_s7 + $0x28] sm:$0xff]   ;;  %v1734_v14 = vld [vmem:[%s2352_s7 + $0x30] sm:$0xff]  }
 0x4ad   : > { %1149 = vmatprep.subr.bf16.mxu0 %v2017_v15  ;;  %1192 = vmatprep.subr.bf16.mxu1 %v2019_v16  ;;  %v1735_v15 = vld [vmem:[%s2352_s7 + $0x38] sm:$0xff]  }
 0x4b0   : > { %1150 = vmatpush1.bf16.msra.mxu0 %v2021_v17  ;;  %1193 = vmatpush1.bf16.msra.mxu1 %v2023_v18 }
 0x4b1   : > { %1151 = vmatprep.subr.bf16.mxu0 %v2029_v19  ;;  %1194 = vmatprep.subr.bf16.mxu1 %v2031_v20 }
 0x4b4   : > { %1152 = vmatpush1.bf16.msra.mxu0 %v2033_v21  ;;  %1195 = vmatpush1.bf16.msra.mxu1 %v2035_v22 }
 0x4b5   : > { %1153 = vmatprep.subr.bf16.mxu0 %v2041_v23  ;;  %1196 = vmatprep.subr.bf16.mxu1 %v2043_v24 }
 0x4b8   : > { %1154 = vmatpush1.bf16.msra.mxu0 %v2045_v25  ;;  %1197 = vmatpush1.bf16.msra.mxu1 %v2047_v26 }
 0x4b9   : > { %1155 = vmatprep.subr.bf16.mxu0 %v2053_v27  ;;  %1198 = vmatprep.subr.bf16.mxu1 %v2055_v28 }
 0x4bc   : > { %1156 = vmatpush1.bf16.msra.mxu0 %v2057_v29  ;;  %1199 = vmatpush1.bf16.msra.mxu1 %v2059_v30 }
 0x4bd   : > { %1157 = vmatprep.subr.bf16.mxu0 %v2065_v31  ;;  %1200 = vmatprep.subr.bf16.mxu1 %v2067_v32 }
 0x4c0   : > { %1158 = vmatpush1.bf16.msra.mxu0 %v2069_v33  ;;  %1201 = vmatpush1.bf16.msra.mxu1 %v2071_v34 }
 0x4c1   : > { %1159 = vmatprep.subr.bf16.mxu0 %v2077_v35  ;;  %1202 = vmatprep.subr.bf16.mxu1 %v2079_v36 }
 0x4c4   : > { %1160 = vmatpush1.bf16.msra.mxu0 %v2081_v37  ;;  %1203 = vmatpush1.bf16.msra.mxu1 %v2083_v38 }
 0x4c5   : > { %1573 = vmatprep.subr.bf16.mxu0 %v1843_v0 }
 0x4c7   : > { %1178 = vmatmul.mubr.bf16.vlgmr.msra.gmra.mrb[8].mxu0 %v1053_v7  ;;  %1221 = vmatmul.mubr.bf16.vlgmr.msra.gmra.mrb[12].mxu1 %v1053_v7 }
 0x4c8   : > { %1574 = vmatpush3.bf16.msra.mxu0 %v1728_v1  ;;  %1589 = vmatprep.mubr.msk.bf16.mxu0 %vm1844_vm1, %v1843_v0  ;;  %vm1351_vm1 = vcmask 392384  }
 0x4c9   : > { %1575 = vmatprep.subr.bf16.mxu0 %v1843_v0 }
 0x4cc   : > { %1576 = vmatpush3.bf16.msra.mxu0 %v1729_v9 }
 0x4cd   : > { %1577 = vmatprep.subr.bf16.mxu0 %v1843_v0 }
 0x4d0   : > { %1578 = vmatpush3.bf16.msra.mxu0 %v1730_v10 }
 0x4d1   : > { %1579 = vmatprep.subr.bf16.mxu0 %v1843_v0 }
 0x4d4   : > { %1580 = vmatpush3.bf16.msra.mxu0 %v1731_v11 }
 0x4d5   : > { %1581 = vmatprep.subr.bf16.mxu0 %v1843_v0 }
 0x4d8   : > { %1582 = vmatpush3.bf16.msra.mxu0 %v1732_v12 }
 0x4d9   : > { %1583 = vmatprep.subr.bf16.mxu0 %v1843_v0 }
 0x4dc   : > { %1584 = vmatpush3.bf16.msra.mxu0 %v1733_v13 }
 0x4dd   : > { %1585 = vmatprep.subr.bf16.mxu0 %v1843_v0 }
 0x4e0   : > { %1586 = vmatpush3.bf16.msra.mxu0 %v1734_v14 }
 0x4e1   : > { %1587 = vmatprep.subr.bf16.mxu0 %v1843_v0 }
 0x4e4   : > { %1588 = vmatpush3.bf16.msra.mxu0 %v1735_v15 }
 0x59a   : > { %v1179_v16 = vpop.f32.mrb[8].mxu0  ;;  %v1222_v17 = vpop.f32.mrb[12].mxu1 }
 0x59b   : > { %v1181_v18 = vpop.f32.mrb[9].mxu0  ;;  %v1224_v19 = vpop.f32.mrb[13].mxu1 }
 0x59c   : > { %v1231_v20 = vmul.f32 %v1181_v18, %v1179_v16  ;;  %v1183_v21 = vpop.f32.mrb[10].mxu0  ;;  %v1226_v22 = vpop.f32.mrb[14].mxu1 }
 0x59d   : > { %v1185_v23 = vpop.f32.mrb[11].mxu0  ;;  %v1228_v24 = vpop.f32.mrb[15].mxu1 }
 0x59e   : > { %v1233_v25 = vmul.f32 %v1231_v20, %v1222_v17  ;;  %v1232_v26 = vmul.f32 %v1185_v23, %v1183_v21 }
 0x5a0   : > { %v1235_v27 = vmul.f32 %v1233_v25, %v1224_v19  ;;  %v1234_v0 = vmul.f32 %v1232_v26, %v1226_v22 }
 0x5a2   : > { %v1236_v28 = vmul.f32 %v1234_v0, %v1228_v24 }
 0x5a4   : > { %v1237_v29 = vpack.c.bf16 %v1236_v28, %v1235_v27 }
 0x5a6   : > { %1590 = vmatmul.mubr.bf16.vlgmr.msra.gmra.mrb[12].mxu0 %v1237_v29 }
 0x679   : > { %v1336_v30 = vpop.f32.mrb[12].mxu0 }
 0x67a   : > { %1345 = vrot.lane.b32.xlu0 %v1336_v30, %s1847_s25  ;;  %v1591_v31 = vpop.f32.mrb[13].mxu0 }
 0x67b   : > { %v1339_v32 = vpop.f32.mrb[14].mxu0 }
 0x67c   : > { %1347 = vrot.lane.b32.xlu1 %v1339_v32, %s1847_s25  ;;  %v1592_v33 = vpop.f32.mrb[15].mxu0 }
 0x6ec   : > { %v1346_v34 = vpop.permute.xlu0 %1345 }
 0x6ed   : > { %1352 = vst.msk [vmem:[%s2167_s17] sm:$0xff] %vm1351_vm1, %v1346_v34 }
 0x6ee   : > { %v1348_v35 = vpop.permute.xlu1 %1347 }
 0x6ef   : > { %1353 = vst.msk [vmem:[%s2167_s17 + $0x8] sm:$0xff] %vm1351_vm1, %v1348_v35 }
 0x6f0   : > { %1785 = shalt.err (!%p1782_p7)
}
 0x6f1   : > { %s1786_s22 = scalar_lea.hbm %s2296_s18, 256  ;;  %s1790_s25 = scalar_lea.hbm %s2353_s8, 512 }
 0x6f2   : > { %p1787_p8 = scmp.ne.s32.totalorder %s2296_s18, %s1786_s22  ;;  %p1791_p1 = scmp.lt.u32.totalorder %s2296_s18, %s2353_s8 }
 0x6f3   : > { %p1792_p0 = scmp.lt.u32.totalorder %s1790_s25, %s1786_s22  ;;  %p1794_p6 = scmp.lt.u32.totalorder %s1786_s22, %s2296_s18 }
 0x6f4   : > { %p1788_p11 = pnand %p1787_p8, %p2364_p9 }
 0x6f5   : > { %p1793_p5 = por %p1792_p0, %p1791_p1 }
 0x6f6   : > { %p1789_p13 = pneg %p1788_p11 }
 0x6f7   : > { %p1795_p10 = por %p1794_p6, %p1793_p5 }
 0x6f9   : > { %p1796_p12 = pnand %p1795_p10, %p1789_p13 }
 0x6fb   : > { %1799 = shalt.err (!%p1796_p12)
}
 0x6fc   : > { %s1849_s13 = smov 128   ;;  %s1850_s9 = smov 8  }
 0x6fd   : > { %1613 = dma.vmem_to_hbm [thread:$0]  (%p2364_p9), %s2298_s10, 256, %s2296_s18, %s2304_s21, %s1849_s13, %s1849_s13, %s1850_s9  }
 0x6fe PF: > { %p1625_p2 = scmp.ge.s32.totalorder %s1838_s30, 2  ;;  %s1383_s23 = sand.u32 1, %s1826_s27  }
 0x6ff   : > { %p2365_p3 = scmp.ne.s32.totalorder %s2358_s16, 0  ;;  %s1384_s19 = scalar_lea.sflag [#allocation5], %s1383_s23 }
 0x701   : > { %p1620_p4 = pnand %p1625_p2, %p2365_p3 }
 0x703   : > { %1821 = dma.done.wait (!%p1620_p4), %s1384_s19, 256  }
 0x704   : > { %1823 = vsyncadd (!%p1620_p4), %s1384_s19, 4294967040  ;;  %p19_p7 = scmp.ge.s32.totalorder %s1921_s11, 4   ;;  %s2366_s27 = smov %s1830_s28 }
 0x705   : > { %s2367_s28 = smov %s1834_s29  ;;  %s2368_s29 = smov %s1932_s14 }
 0x706   : > { %s2369_s30 = smov %s1921_s11  ;;  %21 = sbr.rel (!%p19_p7) target bundleno = 4 (0x4), region = 92 }
 0x70d   :  { %1389 = vsyncpa [#allocation4], 1 }
 0x70e   :  { %1391 = vsyncpa [#allocation4 + $0x1], 1 }
 0x70f   :  { %1392 = vsyncpa [#allocation5], 1 }
 0x710   :  { %1394 = vsyncpa [#allocation5 + $0x1], 1 }

</bundles_post_ra>
